<compile_context>
chip_gen: v5e
topology: v5e:2x2
jax: 0.10.0
libtpu: 0.0.40
codegen_flags: <defaults>
</compile_context>

<pallas_src>
import math
import functools

import jax
import jax.numpy as jnp
from jax import lax
from jax.experimental import pallas as pl
from jax.experimental.pallas import tpu as pltpu


# ----------------------------- sizing helpers ------------------------------

def _vmem_limit_bytes():
    """Generation-aware scoped-VMEM budget: ~3/4 of physical VMEM."""
    phys = 64 * 1024 * 1024            # conservative default = v7x physical VMEM
    try:
        info = pltpu.get_tpu_info()
        cap = getattr(info, "vmem_capacity_bytes", None)
        if cap:
            phys = int(cap)
    except Exception:
        pass
    return int((phys * 3) // 4)        # ~96 MiB on v5e/v6e (128 MiB), ~48 MiB on v7x


def _choose_bt(B, S):
    """Batches per grid step: a few hundred rows per step to amortize the ~0.35us
    per-step overhead, but keep >= 2 grid steps when B >= 2 so the v7x megacore has a
    parallel axis to shard."""
    target_rows = 512
    best = 1
    for cand in range(1, B + 1):
        if B % cand:
            continue
        if cand * S > target_rows:
            continue
        if B // cand >= 2 or B == 1:
            best = cand
    return best


# ------------------------------- fused kernel ------------------------------

def _fused_residual_mha_kernel(ln_ref, x_ref, wqkv_ref, bqkv_ref, wo_ref, bo_ref,
                               o_ref, attn_ref, *,
                               eps, inv_nm1, d_model, n_heads, d_k, s_len, bt, scale):
    """One grid step = `bt` full batches (tm = bt*s_len rows):
       LN -> QKV proj -> per-head attention into VMEM slab -> out proj + residual."""
    alpha = ln_ref[0]
    beta = ln_ref[1]

    x = x_ref[...].astype(jnp.float32)                       # (tm, d_model)

    # LayerNorm (torch semantics: unbiased std (ddof=1), divide by (std + eps)).
    mean = jnp.mean(x, axis=-1, keepdims=True)
    diff = x - mean
    var = jnp.sum(diff * diff, axis=-1, keepdims=True) * inv_nm1
    inv_std = pl.reciprocal(jnp.sqrt(var) + eps, approx=True)   # EUP slot, off the VALU
    xn = alpha * diff * inv_std + beta

    # Fused QKV projection: bf16 operands on the MXU, f32 accumulation.
    qkv = jnp.dot(xn.astype(jnp.bfloat16), wqkv_ref[...],
                  preferred_element_type=jnp.float32)
    qkv = qkv + bqkv_ref[...]                                 # (tm, 3*d_model) f32

    # Multi-head attention; each head's (S, d_k) result goes straight into the scratch
    # slab (no Python-list accumulation / concatenate).
    contract_last = (((1,), (1,)), ((), ()))                  # q @ k^T, no explicit .T
    for b in range(bt):                                       # static unroll (bt small)
        r0 = b * s_len
        r1 = r0 + s_len
        for hh in range(n_heads):                             # static unroll over heads
            c0 = hh * d_k
            qh = qkv[r0:r1, c0:c0 + d_k]
            kh = qkv[r0:r1, d_model + c0:d_model + c0 + d_k]
            vh = qkv[r0:r1, 2 * d_model + c0:2 * d_model + c0 + d_k]
            s = lax.dot_general(qh, kh, contract_last,
                                preferred_element_type=jnp.float32) * scale    # (S, S)
            m = jnp.max(s, axis=-1, keepdims=True)
            e = jnp.exp(s - m)
            p = e * pl.reciprocal(jnp.sum(e, axis=-1, keepdims=True), approx=True)
            # TODO(synk): training-mode dropout on attention probabilities not
            # implemented (inference identity).
            attn_ref[r0:r1, c0:c0 + d_k] = jnp.dot(
                p, vh, preferred_element_type=jnp.float32)

    # Output projection fused with the residual add (bf16 MXU operands, f32 acc).
    proj = jnp.dot(attn_ref[...].astype(jnp.bfloat16), wo_ref[...],
                   preferred_element_type=jnp.float32)
    # TODO(synk): training-mode dropout on the sublayer output not implemented
    # (inference identity), matching the eval-mode reference path.
    o_ref[...] = (x + proj + bo_ref[...]).astype(o_ref.dtype)


# ------------------------------ module wrapper ------------------------------

def init_params(key, d_model, h):
    assert d_model % h == 0
    ks = jax.random.split(key, 8)
    scale = 1.0 / math.sqrt(d_model)

    def lin(kw, kb, d_out):
        w = jax.random.uniform(kw, (d_model, d_out), jnp.float32, -scale, scale)
        b = jax.random.uniform(kb, (d_out,), jnp.float32, -scale, scale)
        return w, b

    w_q, b_q = lin(ks[0], ks[1], d_model)
    w_k, b_k = lin(ks[2], ks[3], d_model)
    w_v, b_v = lin(ks[4], ks[5], d_model)
    w_o, b_o = lin(ks[6], ks[7], d_model)
    return dict(
        h=h,
        eps=1e-6,
        # LayerNormalization params: alpha = ones(1), bias = zeros(1)
        ln_ab=jnp.array([1.0, 0.0], jnp.float32),
        # Fused QKV weight/bias (Q | K | V along the output dim). Weights stored in
        # bf16: full-rate MXU operands and half the resident VMEM footprint.
        w_qkv=jnp.concatenate([w_q, w_k, w_v], axis=1).astype(jnp.bfloat16),
        b_qkv=jnp.concatenate([b_q, b_k, b_v], axis=0),
        w_o=w_o.astype(jnp.bfloat16),
        b_o=b_o,
    )


def residual_connection_forward(params, x):
    """x + dropout(MHA(norm(x), norm(x), norm(x))); dropout = identity (inference)."""
    B, S, d_model = x.shape
    h = int(params["h"])
    d_k = d_model // h
    bt = _choose_bt(B, S)
    tm = bt * S                       # rows per grid step (aligned to batch boundaries)
    M = B * S

    x2d = x.reshape(M, d_model)
    b_qkv = params["b_qkv"].reshape(1, 3 * d_model)
    b_o = params["b_o"].reshape(1, d_model)

    kern = functools.partial(
        _fused_residual_mha_kernel,
        eps=float(params["eps"]), inv_nm1=1.0 / float(d_model - 1),
        d_model=d_model, n_heads=h, d_k=d_k,
        s_len=S, bt=bt, scale=1.0 / math.sqrt(d_k))

    def build(single_buffer_weights):
        def const_spec(shape):
            # Constant-index resident blocks: single-buffer to halve their VMEM cost
            # (matters most under v7x's 64 MiB physical VMEM).
            if single_buffer_weights:
                return pl.BlockSpec(shape, lambda i: (0, 0),
                                    pipeline_mode=pl.Buffered(1))
            return pl.BlockSpec(shape, lambda i: (0, 0))

        return pl.pallas_call(
            kern,
            out_shape=jax.ShapeDtypeStruct((M, d_model), x.dtype),
            grid=(M // tm,),
            in_specs=[
                pl.BlockSpec(memory_space=pltpu.MemorySpace.SMEM),   # (alpha, beta)
                pl.BlockSpec((tm, d_model), lambda i: (i, 0)),       # x row tile
                const_spec((d_model, 3 * d_model)),                  # W_qkv (bf16)
                const_spec((1, 3 * d_model)),                        # b_qkv
                const_spec((d_model, d_model)),                      # W_o (bf16)
                const_spec((1, d_model)),                            # b_o
            ],
            out_specs=pl.BlockSpec((tm, d_model), lambda i: (i, 0)),
            scratch_shapes=[pltpu.VMEM((tm, d_model), jnp.float32)],  # per-head attn slab
            compiler_params=pltpu.CompilerParams(
                dimension_semantics=("parallel",),
                vmem_limit_bytes=_vmem_limit_bytes()),
        )

    args = (params["ln_ab"], x2d, params["w_qkv"], b_qkv, params["w_o"], b_o)
    try:
        out = build(True)(*args)
    except Exception:
        # Fallback if pipeline_mode=pl.Buffered(1) is unsupported on this JAX build.
        out = build(False)(*args)
    return out.reshape(B, S, d_model)


# ------------------------------ pure-JAX reference ---------------------------

def reference(params, x):
    B, S, d_model = x.shape
    h = int(params["h"])
    d_k = d_model // h
    eps = params["eps"]
    alpha, beta = params["ln_ab"][0], params["ln_ab"][1]

    mean = x.mean(axis=-1, keepdims=True)
    std = jnp.std(x, axis=-1, keepdims=True, ddof=1)          # torch .std(): unbiased
    xn = alpha * (x - mean) / (std + eps) + beta

    w_qkv = params["w_qkv"].astype(jnp.float32)
    w_o = params["w_o"].astype(jnp.float32)

    qkv = xn @ w_qkv + params["b_qkv"]
    q, k, v = (qkv[..., :d_model],
               qkv[..., d_model:2 * d_model],
               qkv[..., 2 * d_model:])

    def split(t):
        return t.reshape(B, S, h, d_k).transpose(0, 2, 1, 3)

    q, k, v = split(q), split(k), split(v)
    s = jnp.einsum("bhqd,bhkd->bhqk", q, k) / math.sqrt(d_k)
    p = jax.nn.softmax(s, axis=-1)
    a = jnp.einsum("bhqk,bhkd->bhqd", p, v).transpose(0, 2, 1, 3).reshape(B, S, d_model)
    return x + (a @ w_o + params["b_o"])


# ---------------------------------- main -------------------------------------

if __name__ == "__main__":
    # d_model a multiple of 128 keeps every output block lane-dense (unmasked stores).
    B, S, d_model, h = 2, 8, 128, 4

    root = jax.random.PRNGKey(0)
    kp, kx = jax.random.split(root, 2)
    params = init_params(kp, d_model, h)
    x = jax.random.normal(kx, (B, S, d_model), jnp.float32)

    out = residual_connection_forward(params, x)
    out = jax.block_until_ready(out)

    ref = reference(params, x)
    assert out.shape == (B, S, d_model)
    max_err = jnp.max(jnp.abs(out - ref))
    # bf16 MXU operands + approx (EUP) reciprocals -> looser-than-f32 tolerance.
    assert jnp.allclose(out, ref, atol=2.5e-2, rtol=2.5e-2), f"max abs err {max_err}"

    print("KERNEL_OK")
</pallas_src>

<mosaic_0001>
module attributes {stable_mosaic.version = 11 : i64} {
  func.func @_fused_residual_mha_kernel(%arg0: i32, %arg1: memref<2xf32, #tpu.memory_space<smem>>, %arg2: memref<8x128xf32, #tpu.memory_space<vmem>>, %arg3: memref<128x384xbf16, #tpu.memory_space<vmem>>, %arg4: memref<1x384xf32, #tpu.memory_space<vmem>>, %arg5: memref<128x128xbf16, #tpu.memory_space<vmem>>, %arg6: memref<1x128xf32, #tpu.memory_space<vmem>>, %arg7: memref<8x128xf32, #tpu.memory_space<vmem>>, %arg8: memref<8x128xf32, #tpu.memory_space<vmem>>) attributes {dimension_semantics = [#tpu.dimension_semantics<parallel>], iteration_bounds = array<i64: 2>, scalar_prefetch = 0 : i64, scratch_operands = 1 : i64, tpu.core_type = #tpu.core_type<tc>, window_params = [{transform_indices = @transform_0, window_bounds = array<i64: 2>}, {transform_indices = @transform_1, window_bounds = array<i64: 8, 128>}, {pipeline_mode = #tpu.pipeline_mode<synchronous>, transform_indices = @transform_2, window_bounds = array<i64: 128, 384>}, {pipeline_mode = #tpu.pipeline_mode<synchronous>, transform_indices = @transform_3, window_bounds = array<i64: 1, 384>}, {pipeline_mode = #tpu.pipeline_mode<synchronous>, transform_indices = @transform_4, window_bounds = array<i64: 128, 128>}, {pipeline_mode = #tpu.pipeline_mode<synchronous>, transform_indices = @transform_5, window_bounds = array<i64: 1, 128>}, {transform_indices = @transform_6, window_bounds = array<i64: 8, 128>}]} {
    %c0 = arith.constant 0 : index
    %0 = memref.load %arg1[%c0] : memref<2xf32, #tpu.memory_space<smem>>
    %c1 = arith.constant 1 : index
    %1 = memref.load %arg1[%c1] : memref<2xf32, #tpu.memory_space<smem>>
    %c0_0 = arith.constant 0 : index
    %c0_1 = arith.constant 0 : index
    %2 = vector.load %arg2[%c0_0, %c0_1] : memref<8x128xf32, #tpu.memory_space<vmem>>, vector<8x128xf32>
    %cst = arith.constant dense<0.000000e+00> : vector<8xf32>
    %3 = vector.multi_reduction <add>, %2, %cst [1] : vector<8x128xf32> to vector<8xf32>
    %4 = vector.shape_cast %3 : vector<8xf32> to vector<8x1xf32>
    %cst_2 = arith.constant 1.280000e+02 : f32
    %5 = vector.broadcast %cst_2 : f32 to vector<8x1xf32>
    %6 = arith.divf %4, %5 : vector<8x1xf32>
    %7 = vector.broadcast %6 : vector<8x1xf32> to vector<8x128xf32>
    %8 = arith.subf %2, %7 : vector<8x128xf32>
    %9 = arith.mulf %8, %8 : vector<8x128xf32>
    %cst_3 = arith.constant dense<0.000000e+00> : vector<8xf32>
    %10 = vector.multi_reduction <add>, %9, %cst_3 [1] : vector<8x128xf32> to vector<8xf32>
    %11 = vector.shape_cast %10 : vector<8xf32> to vector<8x1xf32>
    %cst_4 = arith.constant 0.00787401571 : f32
    %12 = vector.broadcast %cst_4 : f32 to vector<8x1xf32>
    %13 = arith.mulf %11, %12 : vector<8x1xf32>
    %14 = math.sqrt %13 : vector<8x1xf32>
    %cst_5 = arith.constant 9.99999997E-7 : f32
    %15 = vector.broadcast %cst_5 : f32 to vector<8x1xf32>
    %16 = arith.addf %14, %15 : vector<8x1xf32>
    %17 = tpu.reciprocal %16 {approx = true} : vector<8x1xf32> -> vector<8x1xf32>
    %18 = vector.broadcast %0 : f32 to vector<8x128xf32>
    %19 = arith.mulf %18, %8 : vector<8x128xf32>
    %20 = vector.broadcast %17 : vector<8x1xf32> to vector<8x128xf32>
    %21 = arith.mulf %19, %20 : vector<8x128xf32>
    %22 = vector.broadcast %1 : f32 to vector<8x128xf32>
    %23 = arith.addf %21, %22 : vector<8x128xf32>
    %24 = arith.truncf %23 : vector<8x128xf32> to vector<8x128xbf16>
    %c0_6 = arith.constant 0 : index
    %c0_7 = arith.constant 0 : index
    %25 = vector.load %arg3[%c0_6, %c0_7] : memref<128x384xbf16, #tpu.memory_space<vmem>>, vector<128x384xbf16>
    %cst_8 = arith.constant dense<0.000000e+00> : vector<8x384xf32>
    %26 = tpu.matmul %24, %25, %cst_8 {dimension_numbers = #tpu.dot_dimension_numbers<[1], [0], [0], [1], [0, 0, 1, 1], [], []>} : vector<8x128xbf16>, vector<128x384xbf16>, vector<8x384xf32> -> vector<8x384xf32>
    %c0_9 = arith.constant 0 : index
    %c0_10 = arith.constant 0 : index
    %27 = vector.load %arg4[%c0_9, %c0_10] : memref<1x384xf32, #tpu.memory_space<vmem>>, vector<1x384xf32>
    %28 = vector.broadcast %27 : vector<1x384xf32> to vector<8x384xf32>
    %29 = arith.addf %26, %28 : vector<8x384xf32>
    %30 = vector.extract_strided_slice %29 {offsets = [0, 0], sizes = [8, 32], strides = [1, 1]} : vector<8x384xf32> to vector<8x32xf32>
    %31 = vector.extract_strided_slice %29 {offsets = [0, 128], sizes = [8, 32], strides = [1, 1]} : vector<8x384xf32> to vector<8x32xf32>
    %32 = vector.extract_strided_slice %29 {offsets = [0, 256], sizes = [8, 32], strides = [1, 1]} : vector<8x384xf32> to vector<8x32xf32>
    %cst_11 = arith.constant dense<0.000000e+00> : vector<8x8xf32>
    %33 = tpu.matmul %30, %31, %cst_11 {dimension_numbers = #tpu.dot_dimension_numbers<[1], [1], [0], [0], [0, 0, 1, 0], [], []>} : vector<8x32xf32>, vector<8x32xf32>, vector<8x8xf32> -> vector<8x8xf32>
    %cst_12 = arith.constant 0.176776692 : f32
    %34 = vector.broadcast %cst_12 : f32 to vector<8x8xf32>
    %35 = arith.mulf %33, %34 : vector<8x8xf32>
    %cst_13 = arith.constant dense<0xFF800000> : vector<8xf32>
    %36 = vector.multi_reduction <maximumf>, %35, %cst_13 [1] : vector<8x8xf32> to vector<8xf32>
    %37 = vector.shape_cast %36 : vector<8xf32> to vector<8x1xf32>
    %38 = vector.broadcast %37 : vector<8x1xf32> to vector<8x8xf32>
    %39 = arith.subf %35, %38 : vector<8x8xf32>
    %40 = math.exp %39 : vector<8x8xf32>
    %cst_14 = arith.constant dense<0.000000e+00> : vector<8xf32>
    %41 = vector.multi_reduction <add>, %40, %cst_14 [1] : vector<8x8xf32> to vector<8xf32>
    %42 = vector.shape_cast %41 : vector<8xf32> to vector<8x1xf32>
    %43 = tpu.reciprocal %42 {approx = true} : vector<8x1xf32> -> vector<8x1xf32>
    %44 = vector.broadcast %43 : vector<8x1xf32> to vector<8x8xf32>
    %45 = arith.mulf %40, %44 : vector<8x8xf32>
    %cst_15 = arith.constant dense<0.000000e+00> : vector<8x32xf32>
    %46 = tpu.matmul %45, %32, %cst_15 {dimension_numbers = #tpu.dot_dimension_numbers<[1], [0], [0], [1], [0, 0, 1, 1], [], []>} : vector<8x8xf32>, vector<8x32xf32>, vector<8x32xf32> -> vector<8x32xf32>
    %c0_16 = arith.constant 0 : index
    %c0_17 = arith.constant 0 : index
    %47 = vector.load %arg8[%c0_16, %c0_17] : memref<8x128xf32, #tpu.memory_space<vmem>>, vector<8x32xf32>
    tpu.vector_store %arg8[%c0_16, %c0_17], %46 {strides = array<i32>} : memref<8x128xf32, #tpu.memory_space<vmem>>, vector<8x32xf32>,
    %48 = vector.extract_strided_slice %29 {offsets = [0, 32], sizes = [8, 32], strides = [1, 1]} : vector<8x384xf32> to vector<8x32xf32>
    %49 = vector.extract_strided_slice %29 {offsets = [0, 160], sizes = [8, 32], strides = [1, 1]} : vector<8x384xf32> to vector<8x32xf32>
    %50 = vector.extract_strided_slice %29 {offsets = [0, 288], sizes = [8, 32], strides = [1, 1]} : vector<8x384xf32> to vector<8x32xf32>
    %cst_18 = arith.constant dense<0.000000e+00> : vector<8x8xf32>
    %51 = tpu.matmul %48, %49, %cst_18 {dimension_numbers = #tpu.dot_dimension_numbers<[1], [1], [0], [0], [0, 0, 1, 0], [], []>} : vector<8x32xf32>, vector<8x32xf32>, vector<8x8xf32> -> vector<8x8xf32>
    %cst_19 = arith.constant 0.176776692 : f32
    %52 = vector.broadcast %cst_19 : f32 to vector<8x8xf32>
    %53 = arith.mulf %51, %52 : vector<8x8xf32>
    %cst_20 = arith.constant dense<0xFF800000> : vector<8xf32>
    %54 = vector.multi_reduction <maximumf>, %53, %cst_20 [1] : vector<8x8xf32> to vector<8xf32>
    %55 = vector.shape_cast %54 : vector<8xf32> to vector<8x1xf32>
    %56 = vector.broadcast %55 : vector<8x1xf32> to vector<8x8xf32>
    %57 = arith.subf %53, %56 : vector<8x8xf32>
    %58 = math.exp %57 : vector<8x8xf32>
    %cst_21 = arith.constant dense<0.000000e+00> : vector<8xf32>
    %59 = vector.multi_reduction <add>, %58, %cst_21 [1] : vector<8x8xf32> to vector<8xf32>
    %60 = vector.shape_cast %59 : vector<8xf32> to vector<8x1xf32>
    %61 = tpu.reciprocal %60 {approx = true} : vector<8x1xf32> -> vector<8x1xf32>
    %62 = vector.broadcast %61 : vector<8x1xf32> to vector<8x8xf32>
    %63 = arith.mulf %58, %62 : vector<8x8xf32>
    %cst_22 = arith.constant dense<0.000000e+00> : vector<8x32xf32>
    %64 = tpu.matmul %63, %50, %cst_22 {dimension_numbers = #tpu.dot_dimension_numbers<[1], [0], [0], [1], [0, 0, 1, 1], [], []>} : vector<8x8xf32>, vector<8x32xf32>, vector<8x32xf32> -> vector<8x32xf32>
    %c0_23 = arith.constant 0 : index
    %c32 = arith.constant 32 : index
    %65 = vector.load %arg8[%c0_23, %c32] : memref<8x128xf32, #tpu.memory_space<vmem>>, vector<8x32xf32>
    tpu.vector_store %arg8[%c0_23, %c32], %64 {strides = array<i32>} : memref<8x128xf32, #tpu.memory_space<vmem>>, vector<8x32xf32>,
    %66 = vector.extract_strided_slice %29 {offsets = [0, 64], sizes = [8, 32], strides = [1, 1]} : vector<8x384xf32> to vector<8x32xf32>
    %67 = vector.extract_strided_slice %29 {offsets = [0, 192], sizes = [8, 32], strides = [1, 1]} : vector<8x384xf32> to vector<8x32xf32>
    %68 = vector.extract_strided_slice %29 {offsets = [0, 320], sizes = [8, 32], strides = [1, 1]} : vector<8x384xf32> to vector<8x32xf32>
    %cst_24 = arith.constant dense<0.000000e+00> : vector<8x8xf32>
    %69 = tpu.matmul %66, %67, %cst_24 {dimension_numbers = #tpu.dot_dimension_numbers<[1], [1], [0], [0], [0, 0, 1, 0], [], []>} : vector<8x32xf32>, vector<8x32xf32>, vector<8x8xf32> -> vector<8x8xf32>
    %cst_25 = arith.constant 0.176776692 : f32
    %70 = vector.broadcast %cst_25 : f32 to vector<8x8xf32>
    %71 = arith.mulf %69, %70 : vector<8x8xf32>
    %cst_26 = arith.constant dense<0xFF800000> : vector<8xf32>
    %72 = vector.multi_reduction <maximumf>, %71, %cst_26 [1] : vector<8x8xf32> to vector<8xf32>
    %73 = vector.shape_cast %72 : vector<8xf32> to vector<8x1xf32>
    %74 = vector.broadcast %73 : vector<8x1xf32> to vector<8x8xf32>
    %75 = arith.subf %71, %74 : vector<8x8xf32>
    %76 = math.exp %75 : vector<8x8xf32>
    %cst_27 = arith.constant dense<0.000000e+00> : vector<8xf32>
    %77 = vector.multi_reduction <add>, %76, %cst_27 [1] : vector<8x8xf32> to vector<8xf32>
    %78 = vector.shape_cast %77 : vector<8xf32> to vector<8x1xf32>
    %79 = tpu.reciprocal %78 {approx = true} : vector<8x1xf32> -> vector<8x1xf32>
    %80 = vector.broadcast %79 : vector<8x1xf32> to vector<8x8xf32>
    %81 = arith.mulf %76, %80 : vector<8x8xf32>
    %cst_28 = arith.constant dense<0.000000e+00> : vector<8x32xf32>
    %82 = tpu.matmul %81, %68, %cst_28 {dimension_numbers = #tpu.dot_dimension_numbers<[1], [0], [0], [1], [0, 0, 1, 1], [], []>} : vector<8x8xf32>, vector<8x32xf32>, vector<8x32xf32> -> vector<8x32xf32>
    %c0_29 = arith.constant 0 : index
    %c64 = arith.constant 64 : index
    %83 = vector.load %arg8[%c0_29, %c64] : memref<8x128xf32, #tpu.memory_space<vmem>>, vector<8x32xf32>
    tpu.vector_store %arg8[%c0_29, %c64], %82 {strides = array<i32>} : memref<8x128xf32, #tpu.memory_space<vmem>>, vector<8x32xf32>,
    %84 = vector.extract_strided_slice %29 {offsets = [0, 96], sizes = [8, 32], strides = [1, 1]} : vector<8x384xf32> to vector<8x32xf32>
    %85 = vector.extract_strided_slice %29 {offsets = [0, 224], sizes = [8, 32], strides = [1, 1]} : vector<8x384xf32> to vector<8x32xf32>
    %86 = vector.extract_strided_slice %29 {offsets = [0, 352], sizes = [8, 32], strides = [1, 1]} : vector<8x384xf32> to vector<8x32xf32>
    %cst_30 = arith.constant dense<0.000000e+00> : vector<8x8xf32>
    %87 = tpu.matmul %84, %85, %cst_30 {dimension_numbers = #tpu.dot_dimension_numbers<[1], [1], [0], [0], [0, 0, 1, 0], [], []>} : vector<8x32xf32>, vector<8x32xf32>, vector<8x8xf32> -> vector<8x8xf32>
    %cst_31 = arith.constant 0.176776692 : f32
    %88 = vector.broadcast %cst_31 : f32 to vector<8x8xf32>
    %89 = arith.mulf %87, %88 : vector<8x8xf32>
    %cst_32 = arith.constant dense<0xFF800000> : vector<8xf32>
    %90 = vector.multi_reduction <maximumf>, %89, %cst_32 [1] : vector<8x8xf32> to vector<8xf32>
    %91 = vector.shape_cast %90 : vector<8xf32> to vector<8x1xf32>
    %92 = vector.broadcast %91 : vector<8x1xf32> to vector<8x8xf32>
    %93 = arith.subf %89, %92 : vector<8x8xf32>
    %94 = math.exp %93 : vector<8x8xf32>
    %cst_33 = arith.constant dense<0.000000e+00> : vector<8xf32>
    %95 = vector.multi_reduction <add>, %94, %cst_33 [1] : vector<8x8xf32> to vector<8xf32>
    %96 = vector.shape_cast %95 : vector<8xf32> to vector<8x1xf32>
    %97 = tpu.reciprocal %96 {approx = true} : vector<8x1xf32> -> vector<8x1xf32>
    %98 = vector.broadcast %97 : vector<8x1xf32> to vector<8x8xf32>
    %99 = arith.mulf %94, %98 : vector<8x8xf32>
    %cst_34 = arith.constant dense<0.000000e+00> : vector<8x32xf32>
    %100 = tpu.matmul %99, %86, %cst_34 {dimension_numbers = #tpu.dot_dimension_numbers<[1], [0], [0], [1], [0, 0, 1, 1], [], []>} : vector<8x8xf32>, vector<8x32xf32>, vector<8x32xf32> -> vector<8x32xf32>
    %c0_35 = arith.constant 0 : index
    %c96 = arith.constant 96 : index
    %101 = vector.load %arg8[%c0_35, %c96] : memref<8x128xf32, #tpu.memory_space<vmem>>, vector<8x32xf32>
    tpu.vector_store %arg8[%c0_35, %c96], %100 {strides = array<i32>} : memref<8x128xf32, #tpu.memory_space<vmem>>, vector<8x32xf32>,
    %c0_36 = arith.constant 0 : index
    %c0_37 = arith.constant 0 : index
    %102 = vector.load %arg8[%c0_36, %c0_37] : memref<8x128xf32, #tpu.memory_space<vmem>>, vector<8x128xf32>
    %103 = arith.truncf %102 : vector<8x128xf32> to vector<8x128xbf16>
    %c0_38 = arith.constant 0 : index
    %c0_39 = arith.constant 0 : index
    %104 = vector.load %arg5[%c0_38, %c0_39] : memref<128x128xbf16, #tpu.memory_space<vmem>>, vector<128x128xbf16>
    %cst_40 = arith.constant dense<0.000000e+00> : vector<8x128xf32>
    %105 = tpu.matmul %103, %104, %cst_40 {dimension_numbers = #tpu.dot_dimension_numbers<[1], [0], [0], [1], [0, 0, 1, 1], [], []>} : vector<8x128xbf16>, vector<128x128xbf16>, vector<8x128xf32> -> vector<8x128xf32>
    %106 = arith.addf %2, %105 : vector<8x128xf32>
    %c0_41 = arith.constant 0 : index
    %c0_42 = arith.constant 0 : index
    %107 = vector.load %arg6[%c0_41, %c0_42] : memref<1x128xf32, #tpu.memory_space<vmem>>, vector<1x128xf32>
    %108 = vector.broadcast %107 : vector<1x128xf32> to vector<8x128xf32>
    %109 = arith.addf %106, %108 : vector<8x128xf32>
    %c0_43 = arith.constant 0 : index
    %c0_44 = arith.constant 0 : index
    %110 = vector.load %arg7[%c0_43, %c0_44] : memref<8x128xf32, #tpu.memory_space<vmem>>, vector<8x128xf32>
    tpu.vector_store %arg7[%c0_43, %c0_44], %109 {strides = array<i32>} : memref<8x128xf32, #tpu.memory_space<vmem>>, vector<8x128xf32>,
    return
  }
  func.func @transform_0(%arg0: i32) -> i32 {
    %c0_i32 = arith.constant 0 : i32
    %c0_i32_0 = arith.constant 0 : i32
    return %c0_i32 : i32
  }
  func.func @transform_1(%arg0: i32) -> (i32, i32) {
    %c0_i32 = arith.constant 0 : i32
    %c0_i32_0 = arith.constant 0 : i32
    return %arg0, %c0_i32 : i32, i32
  }
  func.func @transform_2(%arg0: i32) -> (i32, i32) {
    %c0_i32 = arith.constant 0 : i32
    %c0_i32_0 = arith.constant 0 : i32
    %c0_i32_1 = arith.constant 0 : i32
    return %c0_i32, %c0_i32_0 : i32, i32
  }
  func.func @transform_3(%arg0: i32) -> (i32, i32) {
    %c0_i32 = arith.constant 0 : i32
    %c0_i32_0 = arith.constant 0 : i32
    %c0_i32_1 = arith.constant 0 : i32
    return %c0_i32, %c0_i32_0 : i32, i32
  }
  func.func @transform_4(%arg0: i32) -> (i32, i32) {
    %c0_i32 = arith.constant 0 : i32
    %c0_i32_0 = arith.constant 0 : i32
    %c0_i32_1 = arith.constant 0 : i32
    return %c0_i32, %c0_i32_0 : i32, i32
  }
  func.func @transform_5(%arg0: i32) -> (i32, i32) {
    %c0_i32 = arith.constant 0 : i32
    %c0_i32_0 = arith.constant 0 : i32
    %c0_i32_1 = arith.constant 0 : i32
    return %c0_i32, %c0_i32_0 : i32, i32
  }
  func.func @transform_6(%arg0: i32) -> (i32, i32) {
    %c0_i32 = arith.constant 0 : i32
    %c0_i32_0 = arith.constant 0 : i32
    return %arg0, %c0_i32 : i32, i32
  }
}

module attributes {stable_mosaic.version = 11 : i64} {
  func.func @_fused_residual_mha_kernel(%arg0: i32, %arg1: memref<2xf32, #tpu.memory_space<smem>>, %arg2: memref<8x128xf32, #tpu.memory_space<vmem>>, %arg3: memref<128x384xbf16, #tpu.memory_space<vmem>>, %arg4: memref<1x384xf32, #tpu.memory_space<vmem>>, %arg5: memref<128x128xbf16, #tpu.memory_space<vmem>>, %arg6: memref<1x128xf32, #tpu.memory_space<vmem>>, %arg7: memref<8x128xf32, #tpu.memory_space<vmem>>, %arg8: memref<8x128xf32, #tpu.memory_space<vmem>>) attributes {dimension_semantics = [#tpu.dimension_semantics<parallel>], iteration_bounds = array<i64: 2>, scalar_prefetch = 0 : i64, scratch_operands = 1 : i64, tpu.core_type = #tpu.core_type<tc>, window_params = [{transform_indices = @transform_0, window_bounds = array<i64: 2>}, {transform_indices = @transform_1, window_bounds = array<i64: 8, 128>}, {pipeline_mode = #tpu.pipeline_mode<synchronous>, transform_indices = @transform_2, window_bounds = array<i64: 128, 384>}, {pipeline_mode = #tpu.pipeline_mode<synchronous>, transform_indices = @transform_3, window_bounds = array<i64: 1, 384>}, {pipeline_mode = #tpu.pipeline_mode<synchronous>, transform_indices = @transform_4, window_bounds = array<i64: 128, 128>}, {pipeline_mode = #tpu.pipeline_mode<synchronous>, transform_indices = @transform_5, window_bounds = array<i64: 1, 128>}, {transform_indices = @transform_6, window_bounds = array<i64: 8, 128>}]} {
    %c0 = arith.constant 0 : index
    %0 = memref.load %arg1[%c0] : memref<2xf32, #tpu.memory_space<smem>>
    %c1 = arith.constant 1 : index
    %1 = memref.load %arg1[%c1] : memref<2xf32, #tpu.memory_space<smem>>
    %c0_0 = arith.constant 0 : index
    %c0_1 = arith.constant 0 : index
    %2 = vector.load %arg2[%c0_0, %c0_1] : memref<8x128xf32, #tpu.memory_space<vmem>>, vector<8x128xf32>
    %cst = arith.constant dense<0.000000e+00> : vector<8xf32>
    %3 = vector.multi_reduction <add>, %2, %cst [1] : vector<8x128xf32> to vector<8xf32>
    %4 = vector.shape_cast %3 : vector<8xf32> to vector<8x1xf32>
    %cst_2 = arith.constant 1.280000e+02 : f32
    %5 = vector.broadcast %cst_2 : f32 to vector<8x1xf32>
    %6 = arith.divf %4, %5 : vector<8x1xf32>
    %7 = vector.broadcast %6 : vector<8x1xf32> to vector<8x128xf32>
    %8 = arith.subf %2, %7 : vector<8x128xf32>
    %9 = arith.mulf %8, %8 : vector<8x128xf32>
    %cst_3 = arith.constant dense<0.000000e+00> : vector<8xf32>
    %10 = vector.multi_reduction <add>, %9, %cst_3 [1] : vector<8x128xf32> to vector<8xf32>
    %11 = vector.shape_cast %10 : vector<8xf32> to vector<8x1xf32>
    %cst_4 = arith.constant 0.00787401571 : f32
    %12 = vector.broadcast %cst_4 : f32 to vector<8x1xf32>
    %13 = arith.mulf %11, %12 : vector<8x1xf32>
    %14 = math.sqrt %13 : vector<8x1xf32>
    %cst_5 = arith.constant 9.99999997E-7 : f32
    %15 = vector.broadcast %cst_5 : f32 to vector<8x1xf32>
    %16 = arith.addf %14, %15 : vector<8x1xf32>
    %17 = tpu.reciprocal %16 {approx = true} : vector<8x1xf32> -> vector<8x1xf32>
    %18 = vector.broadcast %0 : f32 to vector<8x128xf32>
    %19 = arith.mulf %18, %8 : vector<8x128xf32>
    %20 = vector.broadcast %17 : vector<8x1xf32> to vector<8x128xf32>
    %21 = arith.mulf %19, %20 : vector<8x128xf32>
    %22 = vector.broadcast %1 : f32 to vector<8x128xf32>
    %23 = arith.addf %21, %22 : vector<8x128xf32>
    %24 = arith.truncf %23 : vector<8x128xf32> to vector<8x128xbf16>
    %c0_6 = arith.constant 0 : index
    %c0_7 = arith.constant 0 : index
    %25 = vector.load %arg3[%c0_6, %c0_7] : memref<128x384xbf16, #tpu.memory_space<vmem>>, vector<128x384xbf16>
    %cst_8 = arith.constant dense<0.000000e+00> : vector<8x384xf32>
    %26 = tpu.matmul %24, %25, %cst_8 {dimension_numbers = #tpu.dot_dimension_numbers<[1], [0], [0], [1], [0, 0, 1, 1], [], []>} : vector<8x128xbf16>, vector<128x384xbf16>, vector<8x384xf32> -> vector<8x384xf32>
    %c0_9 = arith.constant 0 : index
    %c0_10 = arith.constant 0 : index
    %27 = vector.load %arg4[%c0_9, %c0_10] : memref<1x384xf32, #tpu.memory_space<vmem>>, vector<1x384xf32>
    %28 = vector.broadcast %27 : vector<1x384xf32> to vector<8x384xf32>
    %29 = arith.addf %26, %28 : vector<8x384xf32>
    %30 = vector.extract_strided_slice %29 {offsets = [0, 0], sizes = [8, 32], strides = [1, 1]} : vector<8x384xf32> to vector<8x32xf32>
    %31 = vector.extract_strided_slice %29 {offsets = [0, 128], sizes = [8, 32], strides = [1, 1]} : vector<8x384xf32> to vector<8x32xf32>
    %32 = vector.extract_strided_slice %29 {offsets = [0, 256], sizes = [8, 32], strides = [1, 1]} : vector<8x384xf32> to vector<8x32xf32>
    %cst_11 = arith.constant dense<0.000000e+00> : vector<8x8xf32>
    %33 = tpu.matmul %30, %31, %cst_11 {dimension_numbers = #tpu.dot_dimension_numbers<[1], [1], [0], [0], [0, 0, 1, 0], [], []>} : vector<8x32xf32>, vector<8x32xf32>, vector<8x8xf32> -> vector<8x8xf32>
    %cst_12 = arith.constant 0.176776692 : f32
    %34 = vector.broadcast %cst_12 : f32 to vector<8x8xf32>
    %35 = arith.mulf %33, %34 : vector<8x8xf32>
    %cst_13 = arith.constant dense<0xFF800000> : vector<8xf32>
    %36 = vector.multi_reduction <maximumf>, %35, %cst_13 [1] : vector<8x8xf32> to vector<8xf32>
    %37 = vector.shape_cast %36 : vector<8xf32> to vector<8x1xf32>
    %38 = vector.broadcast %37 : vector<8x1xf32> to vector<8x8xf32>
    %39 = arith.subf %35, %38 : vector<8x8xf32>
    %40 = math.exp %39 : vector<8x8xf32>
    %cst_14 = arith.constant dense<0.000000e+00> : vector<8xf32>
    %41 = vector.multi_reduction <add>, %40, %cst_14 [1] : vector<8x8xf32> to vector<8xf32>
    %42 = vector.shape_cast %41 : vector<8xf32> to vector<8x1xf32>
    %43 = tpu.reciprocal %42 {approx = true} : vector<8x1xf32> -> vector<8x1xf32>
    %44 = vector.broadcast %43 : vector<8x1xf32> to vector<8x8xf32>
    %45 = arith.mulf %40, %44 : vector<8x8xf32>
    %cst_15 = arith.constant dense<0.000000e+00> : vector<8x32xf32>
    %46 = tpu.matmul %45, %32, %cst_15 {dimension_numbers = #tpu.dot_dimension_numbers<[1], [0], [0], [1], [0, 0, 1, 1], [], []>} : vector<8x8xf32>, vector<8x32xf32>, vector<8x32xf32> -> vector<8x32xf32>
    %c0_16 = arith.constant 0 : index
    %c0_17 = arith.constant 0 : index
    %47 = vector.load %arg8[%c0_16, %c0_17] : memref<8x128xf32, #tpu.memory_space<vmem>>, vector<8x32xf32>
    tpu.vector_store %arg8[%c0_16, %c0_17], %46 {strides = array<i32>} : memref<8x128xf32, #tpu.memory_space<vmem>>, vector<8x32xf32>,
    %48 = vector.extract_strided_slice %29 {offsets = [0, 32], sizes = [8, 32], strides = [1, 1]} : vector<8x384xf32> to vector<8x32xf32>
    %49 = vector.extract_strided_slice %29 {offsets = [0, 160], sizes = [8, 32], strides = [1, 1]} : vector<8x384xf32> to vector<8x32xf32>
    %50 = vector.extract_strided_slice %29 {offsets = [0, 288], sizes = [8, 32], strides = [1, 1]} : vector<8x384xf32> to vector<8x32xf32>
    %cst_18 = arith.constant dense<0.000000e+00> : vector<8x8xf32>
    %51 = tpu.matmul %48, %49, %cst_18 {dimension_numbers = #tpu.dot_dimension_numbers<[1], [1], [0], [0], [0, 0, 1, 0], [], []>} : vector<8x32xf32>, vector<8x32xf32>, vector<8x8xf32> -> vector<8x8xf32>
    %cst_19 = arith.constant 0.176776692 : f32
    %52 = vector.broadcast %cst_19 : f32 to vector<8x8xf32>
    %53 = arith.mulf %51, %52 : vector<8x8xf32>
    %cst_20 = arith.constant dense<0xFF800000> : vector<8xf32>
    %54 = vector.multi_reduction <maximumf>, %53, %cst_20 [1] : vector<8x8xf32> to vector<8xf32>
    %55 = vector.shape_cast %54 : vector<8xf32> to vector<8x1xf32>
    %56 = vector.broadcast %55 : vector<8x1xf32> to vector<8x8xf32>
    %57 = arith.subf %53, %56 : vector<8x8xf32>
    %58 = math.exp %57 : vector<8x8xf32>
    %cst_21 = arith.constant dense<0.000000e+00> : vector<8xf32>
    %59 = vector.multi_reduction <add>, %58, %cst_21 [1] : vector<8x8xf32> to vector<8xf32>
    %60 = vector.shape_cast %59 : vector<8xf32> to vector<8x1xf32>
    %61 = tpu.reciprocal %60 {approx = true} : vector<8x1xf32> -> vector<8x1xf32>
    %62 = vector.broadcast %61 : vector<8x1xf32> to vector<8x8xf32>
    %63 = arith.mulf %58, %62 : vector<8x8xf32>
    %cst_22 = arith.constant dense<0.000000e+00> : vector<8x32xf32>
    %64 = tpu.matmul %63, %50, %cst_22 {dimension_numbers = #tpu.dot_dimension_numbers<[1], [0], [0], [1], [0, 0, 1, 1], [], []>} : vector<8x8xf32>, vector<8x32xf32>, vector<8x32xf32> -> vector<8x32xf32>
    %c0_23 = arith.constant 0 : index
    %c32 = arith.constant 32 : index
    %65 = vector.load %arg8[%c0_23, %c32] : memref<8x128xf32, #tpu.memory_space<vmem>>, vector<8x32xf32>
    tpu.vector_store %arg8[%c0_23, %c32], %64 {strides = array<i32>} : memref<8x128xf32, #tpu.memory_space<vmem>>, vector<8x32xf32>,
    %66 = vector.extract_strided_slice %29 {offsets = [0, 64], sizes = [8, 32], strides = [1, 1]} : vector<8x384xf32> to vector<8x32xf32>
    %67 = vector.extract_strided_slice %29 {offsets = [0, 192], sizes = [8, 32], strides = [1, 1]} : vector<8x384xf32> to vector<8x32xf32>
    %68 = vector.extract_strided_slice %29 {offsets = [0, 320], sizes = [8, 32], strides = [1, 1]} : vector<8x384xf32> to vector<8x32xf32>
    %cst_24 = arith.constant dense<0.000000e+00> : vector<8x8xf32>
    %69 = tpu.matmul %66, %67, %cst_24 {dimension_numbers = #tpu.dot_dimension_numbers<[1], [1], [0], [0], [0, 0, 1, 0], [], []>} : vector<8x32xf32>, vector<8x32xf32>, vector<8x8xf32> -> vector<8x8xf32>
    %cst_25 = arith.constant 0.176776692 : f32
    %70 = vector.broadcast %cst_25 : f32 to vector<8x8xf32>
    %71 = arith.mulf %69, %70 : vector<8x8xf32>
    %cst_26 = arith.constant dense<0xFF800000> : vector<8xf32>
    %72 = vector.multi_reduction <maximumf>, %71, %cst_26 [1] : vector<8x8xf32> to vector<8xf32>
    %73 = vector.shape_cast %72 : vector<8xf32> to vector<8x1xf32>
    %74 = vector.broadcast %73 : vector<8x1xf32> to vector<8x8xf32>
    %75 = arith.subf %71, %74 : vector<8x8xf32>
    %76 = math.exp %75 : vector<8x8xf32>
    %cst_27 = arith.constant dense<0.000000e+00> : vector<8xf32>
    %77 = vector.multi_reduction <add>, %76, %cst_27 [1] : vector<8x8xf32> to vector<8xf32>
    %78 = vector.shape_cast %77 : vector<8xf32> to vector<8x1xf32>
    %79 = tpu.reciprocal %78 {approx = true} : vector<8x1xf32> -> vector<8x1xf32>
    %80 = vector.broadcast %79 : vector<8x1xf32> to vector<8x8xf32>
    %81 = arith.mulf %76, %80 : vector<8x8xf32>
    %cst_28 = arith.constant dense<0.000000e+00> : vector<8x32xf32>
    %82 = tpu.matmul %81, %68, %cst_28 {dimension_numbers = #tpu.dot_dimension_numbers<[1], [0], [0], [1], [0, 0, 1, 1], [], []>} : vector<8x8xf32>, vector<8x32xf32>, vector<8x32xf32> -> vector<8x32xf32>
    %c0_29 = arith.constant 0 : index
    %c64 = arith.constant 64 : index
    %83 = vector.load %arg8[%c0_29, %c64] : memref<8x128xf32, #tpu.memory_space<vmem>>, vector<8x32xf32>
    tpu.vector_store %arg8[%c0_29, %c64], %82 {strides = array<i32>} : memref<8x128xf32, #tpu.memory_space<vmem>>, vector<8x32xf32>,
    %84 = vector.extract_strided_slice %29 {offsets = [0, 96], sizes = [8, 32], strides = [1, 1]} : vector<8x384xf32> to vector<8x32xf32>
    %85 = vector.extract_strided_slice %29 {offsets = [0, 224], sizes = [8, 32], strides = [1, 1]} : vector<8x384xf32> to vector<8x32xf32>
    %86 = vector.extract_strided_slice %29 {offsets = [0, 352], sizes = [8, 32], strides = [1, 1]} : vector<8x384xf32> to vector<8x32xf32>
    %cst_30 = arith.constant dense<0.000000e+00> : vector<8x8xf32>
    %87 = tpu.matmul %84, %85, %cst_30 {dimension_numbers = #tpu.dot_dimension_numbers<[1], [1], [0], [0], [0, 0, 1, 0], [], []>} : vector<8x32xf32>, vector<8x32xf32>, vector<8x8xf32> -> vector<8x8xf32>
    %cst_31 = arith.constant 0.176776692 : f32
    %88 = vector.broadcast %cst_31 : f32 to vector<8x8xf32>
    %89 = arith.mulf %87, %88 : vector<8x8xf32>
    %cst_32 = arith.constant dense<0xFF800000> : vector<8xf32>
    %90 = vector.multi_reduction <maximumf>, %89, %cst_32 [1] : vector<8x8xf32> to vector<8xf32>
    %91 = vector.shape_cast %90 : vector<8xf32> to vector<8x1xf32>
    %92 = vector.broadcast %91 : vector<8x1xf32> to vector<8x8xf32>
    %93 = arith.subf %89, %92 : vector<8x8xf32>
    %94 = math.exp %93 : vector<8x8xf32>
    %cst_33 = arith.constant dense<0.000000e+00> : vector<8xf32>
    %95 = vector.multi_reduction <add>, %94, %cst_33 [1] : vector<8x8xf32> to vector<8xf32>
    %96 = vector.shape_cast %95 : vector<8xf32> to vector<8x1xf32>
    %97 = tpu.reciprocal %96 {approx = true} : vector<8x1xf32> -> vector<8x1xf32>
    %98 = vector.broadcast %97 : vector<8x1xf32> to vector<8x8xf32>
    %99 = arith.mulf %94, %98 : vector<8x8xf32>
    %cst_34 = arith.constant dense<0.000000e+00> : vector<8x32xf32>
    %100 = tpu.matmul %99, %86, %cst_34 {dimension_numbers = #tpu.dot_dimension_numbers<[1], [0], [0], [1], [0, 0, 1, 1], [], []>} : vector<8x8xf32>, vector<8x32xf32>, vector<8x32xf32> -> vector<8x32xf32>
    %c0_35 = arith.constant 0 : index
    %c96 = arith.constant 96 : index
    %101 = vector.load %arg8[%c0_35, %c96] : memref<8x128xf32, #tpu.memory_space<vmem>>, vector<8x32xf32>
    tpu.vector_store %arg8[%c0_35, %c96], %100 {strides = array<i32>} : memref<8x128xf32, #tpu.memory_space<vmem>>, vector<8x32xf32>,
    %c0_36 = arith.constant 0 : index
    %c0_37 = arith.constant 0 : index
    %102 = vector.load %arg8[%c0_36, %c0_37] : memref<8x128xf32, #tpu.memory_space<vmem>>, vector<8x128xf32>
    %103 = arith.truncf %102 : vector<8x128xf32> to vector<8x128xbf16>
    %c0_38 = arith.constant 0 : index
    %c0_39 = arith.constant 0 : index
    %104 = vector.load %arg5[%c0_38, %c0_39] : memref<128x128xbf16, #tpu.memory_space<vmem>>, vector<128x128xbf16>
    %cst_40 = arith.constant dense<0.000000e+00> : vector<8x128xf32>
    %105 = tpu.matmul %103, %104, %cst_40 {dimension_numbers = #tpu.dot_dimension_numbers<[1], [0], [0], [1], [0, 0, 1, 1], [], []>} : vector<8x128xbf16>, vector<128x128xbf16>, vector<8x128xf32> -> vector<8x128xf32>
    %106 = arith.addf %2, %105 : vector<8x128xf32>
    %c0_41 = arith.constant 0 : index
    %c0_42 = arith.constant 0 : index
    %107 = vector.load %arg6[%c0_41, %c0_42] : memref<1x128xf32, #tpu.memory_space<vmem>>, vector<1x128xf32>
    %108 = vector.broadcast %107 : vector<1x128xf32> to vector<8x128xf32>
    %109 = arith.addf %106, %108 : vector<8x128xf32>
    %c0_43 = arith.constant 0 : index
    %c0_44 = arith.constant 0 : index
    %110 = vector.load %arg7[%c0_43, %c0_44] : memref<8x128xf32, #tpu.memory_space<vmem>>, vector<8x128xf32>
    tpu.vector_store %arg7[%c0_43, %c0_44], %109 {strides = array<i32>} : memref<8x128xf32, #tpu.memory_space<vmem>>, vector<8x128xf32>,
    return
  }
  func.func @transform_0(%arg0: i32) -> i32 {
    %c0_i32 = arith.constant 0 : i32
    %c0_i32_0 = arith.constant 0 : i32
    return %c0_i32 : i32
  }
  func.func @transform_1(%arg0: i32) -> (i32, i32) {
    %c0_i32 = arith.constant 0 : i32
    %c0_i32_0 = arith.constant 0 : i32
    return %arg0, %c0_i32 : i32, i32
  }
  func.func @transform_2(%arg0: i32) -> (i32, i32) {
    %c0_i32 = arith.constant 0 : i32
    %c0_i32_0 = arith.constant 0 : i32
    %c0_i32_1 = arith.constant 0 : i32
    return %c0_i32, %c0_i32_0 : i32, i32
  }
  func.func @transform_3(%arg0: i32) -> (i32, i32) {
    %c0_i32 = arith.constant 0 : i32
    %c0_i32_0 = arith.constant 0 : i32
    %c0_i32_1 = arith.constant 0 : i32
    return %c0_i32, %c0_i32_0 : i32, i32
  }
  func.func @transform_4(%arg0: i32) -> (i32, i32) {
    %c0_i32 = arith.constant 0 : i32
    %c0_i32_0 = arith.constant 0 : i32
    %c0_i32_1 = arith.constant 0 : i32
    return %c0_i32, %c0_i32_0 : i32, i32
  }
  func.func @transform_5(%arg0: i32) -> (i32, i32) {
    %c0_i32 = arith.constant 0 : i32
    %c0_i32_0 = arith.constant 0 : i32
    %c0_i32_1 = arith.constant 0 : i32
    return %c0_i32, %c0_i32_0 : i32, i32
  }
  func.func @transform_6(%arg0: i32) -> (i32, i32) {
    %c0_i32 = arith.constant 0 : i32
    %c0_i32_0 = arith.constant 0 : i32
    return %arg0, %c0_i32 : i32, i32
  }
}

</mosaic_0001>

<bundles_post_ra>
// kernel: tpu_custom_call.1
= control target key start
LH: loop header
LB: loop body
LE: loop exit
PB: predicated region body
PF: predicated region fallthrough
CT: control target
= control target key end

     0   :  { %s1876_s0 = inlined_call_operand.hbm [shape: f32[2], index: 0, kind: input, shape index: {}]   ;;  %s1877_s1 = inlined_call_operand.hbm [shape: f32[16,128], index: 1, kind: input, shape index: {}]   ;;  %s1878_s2 = inlined_call_operand.hbm [shape: bf16[128,384], index: 2, kind: input, shape index: {}]   ;;  %s1879_s3 = inlined_call_operand.hbm [shape: f32[1,384], index: 3, kind: input, shape index: {}]   ;;  %s1880_s4 = inlined_call_operand.hbm [shape: bf16[128,128], index: 4, kind: input, shape index: {}]   ;;  %s1881_s5 = inlined_call_operand.vmem [shape: f32[1,128], index: 5, kind: input, shape index: {}]   ;;  %s1882_s6 = inlined_call_operand.hbm [shape: f32[16,128], index: 6, kind: output, shape index: {}]  }
   0x1   :  { %1883 = sst [smem:[#allocation19_spill]] %s1876_s0 }
   0x2   :  { %11 = vsyncpa [#allocation6], 0 }
   0x3   :  { %12 = vsyncpa [#allocation4], 0 }
   0x4   :  { %14 = vsyncpa [#allocation4 + $0x1], 0 }
   0x5   :  { %15 = vsyncpa [#allocation9], 0 }
   0x6   :  { %16 = vsyncpa [#allocation12], 0 }
   0x7   :  { %17 = vsyncpa [#allocation5], 0 }
   0x8   :  { %19 = vsyncpa [#allocation5 + $0x1], 0  ;;  %s1643_s21 = smov 0   ;;  %s1645_s22 = smov 0  }
   0x9   :  { %s1647_s23 = smov 0   ;;  %s1649_s24 = smov 0  }
   0xa LB: > { %s208_s27 = sshll.u32 %s1878_s2, 4  ;;  %s1667_s28 = sadd.s32 4294967295, %s1594_s24   ;;  %s1594_s24 = sphi %s1649_s24, %s1896_s24   ;;  %s1590_s23 = sphi %s1647_s23, %s1895_s23   ;;  %s1586_s22 = sphi %s1645_s22, %s1894_s22   ;;  %s1582_s21 = sphi %s1643_s21, %s1893_s21   ;;  %s209_s27 = int_to_ptr.hbm [resolvable:$true] %s208_s27 }
   0xb   : > { %p1071_p0 = scmp.ge.s32.totalorder %s1594_s24, 1  ;;  %p67_p1 = scmp.eq.s32.totalorder %s1667_s28, 0 }
   0xc   : > { %p187_p2 = scmp.lt.s32.totalorder %s1594_s24, 3  ;;  %s1596_s30 = smov [#allocation8]  }
   0xd   : > { %s210_s7 = sshll.u32 %s1596_s30, 4  ;;  %s1885_s0 = sld [smem:[#allocation19_spill]]  ;;  %s211_s7 = int_to_ptr.vmem [resolvable:$true] %s210_s7 }
   0xe   : > { %p1672_p3 = pnand %p1071_p0, %p187_p2  ;;  %s223_s14 = sshll.u32 %s1879_s3, 4  ;;  %s224_s14 = int_to_ptr.hbm [resolvable:$true] %s223_s14 }
   0xf   : > { %s1597_s15 = smov 192   ;;  %s1598_s16 = smov 12  }
  0x10   : > { %p1283_p4 = pneg %p1672_p3  ;;  %s1599_s17 = smov [#allocation3]  }
  0x11   : > { %s234_s20 = sshll.u32 %s1880_s4, 4  ;;  %s1600_s25 = smov [#allocation10]   ;;  %s235_s20 = int_to_ptr.hbm [resolvable:$true] %s234_s20 }
  0x12   : > { %p1684_p6 = pnand %p1283_p4, %p67_p1  ;;  %s225_s26 = sshll.u32 %s1600_s25, 4  ;;  %s226_s26 = int_to_ptr.vmem [resolvable:$true] %s225_s26 }
  0x13   : > { %s199_s10 = sshll.u32 %s1885_s0, 4  ;;  %s1603_s8 = smov 4   ;;  %s200_s10 = int_to_ptr.hbm [resolvable:$true] %s199_s10 }
  0x14   : > { %1289 = dma.hbm_to_vmem [thread:$0]  (!%p1684_p6), %s209_s27, 3072, %s211_s7, [#allocation9], %s1597_s15, %s1597_s15, %s1598_s16  }
  0x15   : > { %1286 = dma.hbm_to_smem (!%p1684_p6), %s200_s10, 16, %s1599_s17, [#allocation6]  }
  0x16   : > { %1292 = dma.hbm_to_vmem [thread:$0]  (!%p1684_p6), %s224_s14, 48, %s226_s26, [#allocation9]  }
  0x17   : > { %s1601_s27 = smov [#allocation11]   ;;  %s1602_s7 = smov 64  }
  0x18   : > { %s236_s30 = sshll.u32 %s1601_s27, 4  ;;  %s1070_s9 = sadd.s32 4294967294, %s1594_s24   ;;  %s237_s30 = int_to_ptr.vmem [resolvable:$true] %s236_s30 }
  0x19   : > { %1295 = dma.hbm_to_vmem [thread:$0]  (!%p1684_p6), %s235_s20, 1024, %s237_s30, [#allocation12], %s1602_s7, %s1602_s7, %s1603_s8  }
  0x1a   : > { %s1704_s10 = sadd.s32 1, %s1594_s24   ;;  %s53_s13 = sadd.s32 1, %s1590_s23 }
  0x1b   : > { %s50_s12 = ssub.s32 %s1594_s24, %s1704_s10  ;;  %p60_p8 = scmp.ne.s32.totalorder %s1590_s23, %s1586_s22 }
  0x1c   : > { %p51_p7 = scmp.eq.s32.totalorder %s50_s12, 0  ;;  %p61_p9 = scmp.eq.s32.totalorder %s1594_s24, 0 }
  0x1d   : > { %p66_p10 = scmp.ne.s32.totalorder %s1586_s22, %s1582_s21  ;;  %p174_p13 = scmp.eq.s32.totalorder %s1667_s28, 1 }
  0x1e   : > { %s1715_s14 = scalar_select %p51_p7, %s1590_s23, %s53_s13  }
  0x1f   : > { %p1717_p11 = por %p61_p9, %p60_p8  ;;  %p1723_p12 = por %p67_p1, %p66_p10 }
  0x20   : > { %p180_p0 = scmp.eq.s32.totalorder %s1070_s9, 1  ;;  %p1308_p2 = scmp.lt.s32.totalorder %s1594_s24, 2 }
  0x21   : > { %s253_s16 = sand.u32 1, %s1590_s23   ;;  %p1730_p4 = por %p174_p13, %p60_p8 }
  0x22   : > { %p1734_p6 = por %p180_p0, %p66_p10  ;;  %s1077_s19 = sshll.u32 %s253_s16, 3 }
  0x23   : > { %s1078_s20 = sshll.u32 %s1594_s24, 3  ;;  %s257_s30 = scalar_lea.vmem [#allocation7], %s1077_s19 }
  0x24   : > { %s261_s27 = scalar_lea.hbm %s1877_s1, %s1078_s20  ;;  %s265_s7 = sshll.u32 %s257_s30, 4  ;;  %s266_s7 = int_to_ptr.vmem [resolvable:$true] %s265_s7 }
  0x25   : > { %s263_s8 = sshll.u32 %s261_s27, 4  ;;  %p1744_p7 = pnand %p1308_p2, %p1717_p11  ;;  %s264_s8 = int_to_ptr.hbm [resolvable:$true] %s263_s8 }
  0x26   : > { %s254_s12 = scalar_lea.sflag [#allocation4], %s253_s16  ;;  %s1486_s13 = sshra.s32 %s264_s8, 4  ;;  %s1487_s13 = int_to_ptr.hbm [resolvable:$true] %s1486_s13 }
  0x27   : > { %s1488_s0 = scalar_lea.hbm %s1487_s13, 8  ;;  %p1490_p9 = pneg %p1744_p7 }
  0x28   : > { %p1489_p8 = scmp.ne.s32.totalorder %s1487_s13, %s1488_s0  ;;  %s1493_s25 = scalar_lea.hbm %s1877_s1, 16 }
  0x29   : > { %p1494_p11 = scmp.lt.s32.totalorder %s1487_s13, %s1877_s1  ;;  %p1495_p0 = scmp.lt.s32.totalorder %s1493_s25, %s1488_s0 }
  0x2a   : > { %p1491_p10 = pnand %p1490_p9, %p1489_p8 }
  0x2b   : > { %p1496_p2 = por %p1495_p0, %p1494_p11 }
  0x2c   : > { %p1492_p13 = pneg %p1491_p10 }
  0x2e   : > { %p1497_p5 = pnand %p1496_p2, %p1492_p13 }
  0x30   : > { %1500 = shalt.err (!%p1497_p5)
}
  0x31   : > { %1299 = dma.hbm_to_vmem [thread:$0]  (!%p1744_p7), %s264_s8, 128, %s266_s7, %s254_s12  }
  0x32   : > { %274 = sbr.rel (%p1672_p3) target bundleno = 2059 (0x80b), region = 44 }
  0x37   : > { %1561 = dma.done.wait (%p67_p1), [#allocation6], 16  }
  0x38   : > { %1563 = vsyncadd (%p67_p1), [#allocation6], 4294967280  ;;  %s1765_s16 = sand.u32 1, %s1586_s22  }
  0x39   : > { %s1081_s0 = sshll.u32 %s1765_s16, 3  ;;  %s282_s27 = scalar_lea.sflag [#allocation4], %s1765_s16 }
  0x3a   : > { %s285_s30 = scalar_lea.vmem [#allocation7], %s1081_s0 }
  0x3b   : > { %1565 = dma.done.wait (%p1723_p12), %s282_s27, 128  }
  0x3c   : > { %1567 = vsyncadd (%p1723_p12), %s282_s27, 4294967168 }
  0x3d   : > { %1569 = dma.done.wait (%p67_p1), [#allocation9], 3120  }
  0x3e   : > { %1571 = vsyncadd (%p67_p1), [#allocation9], 4294964176 }
  0x3f   : > { %1573 = dma.done.wait (%p67_p1), [#allocation12], 1024  }
  0x40   : > { %1575 = vsyncadd (%p67_p1), [#allocation12], 4294966272 }
  0x41   : > { %306 = sfence }
  0x42   : > { %v1783_v0 = vld [vmem:[%s285_s30] sm:$0xff]  ;;  %v1604_v1 = vmov 128.0   ;;  %v1173_v12 = vld [vmem:[#allocation8 + $0xa8] sm:$0xf]  ;;  %v1252_v14 = vld [vmem:[#allocation8 + $0xac] sm:$0xf] }
  0x43   : > { %334 = vadd.xlane.f32.xlu0 %v1783_v0  ;;  %1359 = vrcp.f32 %v1604_v1  ;;  %v1253_v13 = vld [vmem:[#allocation8 + $0xb0] sm:$0xf0]  ;;  %v1175_v16 = vld [vmem:[#allocation8 + $0xb4] sm:$0xf0]  ;;  %v1181_v17 = vld [vmem:[#allocation8 + $0xb0] sm:$0xf] }
  0x44   : > { %v1174_v15 = vor.u32 %v1253_v13, %v1173_v12  ;;  %v1254_v18 = vld [vmem:[#allocation8 + $0xb8] sm:$0xf0]  ;;  %v1178_v19 = vor.u32 %v1252_v14, %v1175_v16  ;;  %v1161_v21 = vld [vmem:[#allocation8 + $0x90] sm:$0xf]  ;;  %v1249_v23 = vld [vmem:[#allocation8 + $0x94] sm:$0xf] }
  0x45   : > { %v1182_v20 = vor.u32 %v1254_v18, %v1181_v17  ;;  %v1250_v22 = vld [vmem:[#allocation8 + $0x98] sm:$0xf0]  ;;  %v1163_v25 = vld [vmem:[#allocation8 + $0x9c] sm:$0xf0]  ;;  %v1169_v26 = vld [vmem:[#allocation8 + $0x98] sm:$0xf] }
  0x46   : > { %537 = vmatpush.bf16.msra.mxu0 %v1174_v15  ;;  %550 = vmatpush.bf16.msra.mxu1 %v1178_v19  ;;  %v1162_v24 = vor.u32 %v1250_v22, %v1161_v21  ;;  %v1251_v27 = vld [vmem:[#allocation8 + $0xa0] sm:$0xf0]  ;;  %v1166_v28 = vor.u32 %v1249_v23, %v1163_v25  ;;  %v1149_v30 = vld [vmem:[#allocation8 + $0x78] sm:$0xf]  ;;  %v1246_v32 = vld [vmem:[#allocation8 + $0x7c] sm:$0xf] }
  0x47   : > { %563 = vmatpush.bf16.msra.mxu2 %v1182_v20  ;;  %v1170_v29 = vor.u32 %v1251_v27, %v1169_v26  ;;  %v1247_v31 = vld [vmem:[#allocation8 + $0x80] sm:$0xf0]  ;;  %v1151_v34 = vld [vmem:[#allocation8 + $0x84] sm:$0xf0]  ;;  %v1157_v35 = vld [vmem:[#allocation8 + $0x80] sm:$0xf] }
  0x48   : > { %v1150_v33 = vor.u32 %v1247_v31, %v1149_v30  ;;  %v1248_v36 = vld [vmem:[#allocation8 + $0x88] sm:$0xf0]  ;;  %v1154_v37 = vor.u32 %v1246_v32, %v1151_v34  ;;  %v1137_v39 = vld [vmem:[#allocation8 + $0x60] sm:$0xf]  ;;  %v1243_v41 = vld [vmem:[#allocation8 + $0x64] sm:$0xf] }
  0x49   : > { %v1360_v2 = vpop.eup %1359  ;;  %v1158_v38 = vor.u32 %v1248_v36, %v1157_v35  ;;  %v1244_v40 = vld [vmem:[#allocation8 + $0x68] sm:$0xf0]  ;;  %v1139_v42 = vld [vmem:[#allocation8 + $0x6c] sm:$0xf0]  ;;  %v1145_v43 = vld [vmem:[#allocation8 + $0x68] sm:$0xf] }
  0x4a   : > { %v337_v3 = vmul.f32 128.0, %v1360_v2  ;;  %vm341_vm0 = vweird.f32 %v1360_v2  ;;  %538 = vmatpush.bf16.msra.mxu0 %v1162_v24  ;;  %551 = vmatpush.bf16.msra.mxu1 %v1166_v28  ;;  %v1245_v44 = vld [vmem:[#allocation8 + $0x70] sm:$0xf0]  ;;  %v1138_v45 = vor.u32 %v1244_v40, %v1137_v39  ;;  %v1142_v46 = vor.u32 %v1243_v41, %v1139_v42  ;;  %v1125_v48 = vld [vmem:[#allocation8 + $0x48] sm:$0xf]  ;;  %s331_s29 = sld [smem:[#allocation3]] }
  0x4b   : > { %564 = vmatpush.bf16.msra.mxu2 %v1170_v29  ;;  %v1146_v47 = vor.u32 %v1245_v44, %v1145_v43  ;;  %v1241_v49 = vld [vmem:[#allocation8 + $0x50] sm:$0xf0]  ;;  %v1240_v50 = vld [vmem:[#allocation8 + $0x4c] sm:$0xf]  ;;  %v1127_v51 = vld [vmem:[#allocation8 + $0x54] sm:$0xf0] }
  0x4c   : > { %v338_v4 = vsub.f32 1.0, %v337_v3  ;;  %v1133_v52 = vld [vmem:[#allocation8 + $0x50] sm:$0xf]  ;;  %v1242_v53 = vld [vmem:[#allocation8 + $0x58] sm:$0xf0]  ;;  %v1126_v54 = vor.u32 %v1241_v49, %v1125_v48  ;;  %v1130_v55 = vor.u32 %v1240_v50, %v1127_v51  ;;  %s1086_s11 = sld [smem:[#allocation3 + $0x1]] }
  0x4d   : > { %v1134_v56 = vor.u32 %v1242_v53, %v1133_v52  ;;  %v1113_v57 = vld [vmem:[#allocation8 + $0x30] sm:$0xf]  ;;  %v1238_v58 = vld [vmem:[#allocation8 + $0x38] sm:$0xf0]  ;;  %v1237_v59 = vld [vmem:[#allocation8 + $0x34] sm:$0xf] }
  0x4e   : > { %v339_v5 = vmul.f32 %v1360_v2, %v338_v4  ;;  %539 = vmatpush.bf16.msra.mxu0 %v1150_v33  ;;  %552 = vmatpush.bf16.msra.mxu1 %v1154_v37  ;;  %v1115_v60 = vld [vmem:[#allocation8 + $0x3c] sm:$0xf0]  ;;  %v1121_v61 = vld [vmem:[#allocation8 + $0x38] sm:$0xf]  ;;  %v1239_v62 = vld [vmem:[#allocation8 + $0x40] sm:$0xf0]  ;;  %v1114_v63 = vor.u32 %v1238_v58, %v1113_v57 }
  0x4f   : > { %565 = vmatpush.bf16.msra.mxu2 %v1158_v38  ;;  %v1118_v1 = vor.u32 %v1237_v59, %v1115_v60  ;;  %v1101_v3 = vld [vmem:[#allocation8 + $0x18] sm:$0xf]  ;;  %v1235_v4 = vld [vmem:[#allocation8 + $0x20] sm:$0xf0]  ;;  %v1089_v13 = vld [vmem:[#allocation8] sm:$0xf] }
  0x50   : > { %v340_v6 = vadd.f32 %v1360_v2, %v339_v5  ;;  %v1234_v5 = vld [vmem:[#allocation8 + $0x1c] sm:$0xf]  ;;  %v1232_v14 = vld [vmem:[#allocation8 + $0x8] sm:$0xf0]  ;;  %v1231_v15 = vld [vmem:[#allocation8 + $0x4] sm:$0xf]  ;;  %v363_v35 = vstv %s331_s29 }
  0x51   : > { %v1091_v16 = vld [vmem:[#allocation8 + $0xc] sm:$0xf0]  ;;  %v1097_v17 = vld [vmem:[#allocation8 + $0x8] sm:$0xf]  ;;  %v1233_v18 = vld [vmem:[#allocation8 + $0x10] sm:$0xf0]  ;;  %v1090_v20 = vor.u32 %v1232_v14, %v1089_v13 }
  0x52   : > { %v342_v7 = vsel %vm341_vm0, %v1360_v2, %v340_v6  ;;  %540 = vmatpush.bf16.msra.mxu0 %v1138_v45  ;;  %553 = vmatpush.bf16.msra.mxu1 %v1142_v46  ;;  %v1122_v2 = vor.u32 %v1239_v62, %v1121_v61  ;;  %v1103_v6 = vld [vmem:[#allocation8 + $0x24] sm:$0xf0]  ;;  %v1094_v22 = vor.u32 %v1231_v15, %v1091_v16  ;;  %v366_v38 = vstv %s1086_s11  ;;  %v401_v42 = vld [vmem:[#allocation10] sm:$0x7]  ;;  %s1605_s7 = smov 96   ;;  %s1606_s8 = smov 32  }
  0x53   : > { %566 = vmatpush.bf16.msra.mxu2 %v1146_v47  ;;  %v1098_v23 = vor.u32 %v1233_v18, %v1097_v17  ;;  %v404_v43 = vperm.slane %v401_v42, 1  ;;  %v403_v44 = vperm.slane %v401_v42, 0  ;;  %vm576_vm3 = vcmask 261120   ;;  %s1607_s9 = smov 64   ;;  %s1228_s12 = sshll.u32 %s1667_s28, 3 }
  0x54   : > { %v405_v48 = vperm.slane %v401_v42, 2  ;;  %vm604_vm4 = vcmask 64512   ;;  %vm711_vm5 = vcmask 523520   ;;  %vm783_vm6 = vcmask 785920   ;;  %s954_s20 = scalar_lea.hbm %s1882_s6, %s1228_s12  ;;  %s330_s15 = scalar_lea.vmem [#allocation13], %s1081_s0 }
  0x55   : > { %vm855_vm7 = vcmask 1048320   ;;  %s956_s27 = sshll.u32 %s330_s15, 4  ;;  %s958_s30 = sshll.u32 %s954_s20, 4  ;;  %s957_s27 = int_to_ptr.vmem [resolvable:$true] %s956_s27  ;;  %s959_s30 = int_to_ptr.hbm [resolvable:$true] %s958_s30 }
  0x56   : > { %541 = vmatpush.bf16.msra.mxu0 %v1126_v54  ;;  %554 = vmatpush.bf16.msra.mxu1 %v1130_v55  ;;  %s944_s28 = scalar_lea.sflag [#allocation5], %s1765_s16  ;;  %s1530_s29 = sshra.s32 %s959_s30, 4  ;;  %s1531_s29 = int_to_ptr.hbm [resolvable:$true] %s1530_s29 }
  0x57   : > { %567 = vmatpush.bf16.msra.mxu2 %v1134_v56  ;;  %s1532_s11 = scalar_lea.hbm %s1531_s29, 8  ;;  %s1536_s0 = scalar_lea.hbm %s1882_s6, 16 }
  0x58   : > { %p1533_p1 = scmp.ne.s32.totalorder %s1531_s29, %s1532_s11  ;;  %p1537_p12 = scmp.lt.s32.totalorder %s1531_s29, %s1882_s6 }
  0x59   : > { %p1538_p7 = scmp.lt.s32.totalorder %s1536_s0, %s1532_s11 }
  0x5a   : > { %542 = vmatpush.bf16.msra.mxu0 %v1114_v63  ;;  %555 = vmatpush.bf16.msra.mxu1 %v1118_v1  ;;  %p1534_p3 = pnand %p1533_p1, %p1730_p4 }
  0x5b   : > { %568 = vmatpush.bf16.msra.mxu2 %v1122_v2  ;;  %p1539_p8 = por %p1538_p7, %p1537_p12 }
  0x5c   : > { %p1535_p5 = pneg %p1534_p3 }
  0x5e   : > { %p1540_p9 = pnand %p1539_p8, %p1535_p5 }
  0xb6   : > { %v335_v8 = vpop.xlane.xlu0 %334 }
  0xb7   : > { %v343_v9 = vmul.f32 %v342_v7, %v335_v8  ;;  %v1109_v7 = vld [vmem:[#allocation8 + $0x20] sm:$0xf]  ;;  %v1236_v8 = vld [vmem:[#allocation8 + $0x28] sm:$0xf0] }
  0xb8   : > { %v1110_v12 = vor.u32 %v1236_v8, %v1109_v7 }
  0xb9   : > { %v1787_v10 = vsub.f32 %v1783_v0, %v343_v9  ;;  %v1102_v9 = vor.u32 %v1235_v4, %v1101_v3 }
  0xba   : > { %569 = vmatpush.bf16.msra.mxu2 %v1110_v12 }
  0xbb   : > { %v345_v11 = vmul.f32 %v1787_v10, %v1787_v10  ;;  %543 = vmatpush.bf16.msra.mxu0 %v1102_v9  ;;  %v364_v36 = vmul.f32 %v363_v35, %v1787_v10 }
  0xbd   : > { %346 = vadd.xlane.f32.xlu0 %v345_v11  ;;  %v1106_v11 = vor.u32 %v1234_v5, %v1103_v6 }
  0xbe   : > { %570 = vmatpush.bf16.msra.mxu2 %v1098_v23 }
  0xbf   : > { %556 = vmatpush.bf16.msra.mxu1 %v1106_v11  ;;  %544 = vmatpush.bf16.msra.mxu0 %v1090_v20 }
  0xc3   : > { %557 = vmatpush.bf16.msra.mxu1 %v1094_v22 }
 0x130   : > { %v347_v19 = vpop.xlane.xlu0 %346 }
 0x131   : > { %v348_v21 = vmul.f32 0.007874016, %v347_v19 }
 0x133   : > { %1361 = vrsqrt.f32 %v348_v21  ;;  %vm356_vm1 = vcmp.eq.f32.partialorder %v348_v21, inf  ;;  %v359_v31 = vand.u32 2147483648, %v348_v21  ;;  %vm358_vm2 = vcmp.eq.f32.partialorder %v348_v21, 0.0 }
 0x139   : > { %v1362_v24 = vpop.eup %1361 }
 0x13a   : > { %v350_v25 = vmul.f32 %v1362_v24, %v348_v21 }
 0x13c   : > { %v351_v26 = vmul.f32 %v1362_v24, %v350_v25 }
 0x13e   : > { %v352_v27 = vmul.f32 0.5, %v351_v26 }
 0x140   : > { %v353_v28 = vsub.f32 1.5, %v352_v27 }
 0x142   : > { %v354_v29 = vmul.f32 %v1362_v24, %v353_v28 }
 0x144   : > { %v355_v30 = vmul.f32 %v354_v29, %v348_v21 }
 0x146   : > { %v357_v32 = vsel %vm356_vm1, %v348_v21, %v355_v30 }
 0x147   : > { %v360_v33 = vsel %vm358_vm2, %v359_v31, %v357_v32 }
 0x148   : > { %v361_v34 = vadd.f32 1e-06, %v360_v33 }
 0x14a   : > { %1363 = vrcp.f32 %v361_v34 }
 0x150   : > { %v1364_v37 = vpop.eup %1363 }
 0x151   : > { %v365_v39 = vmul.f32 %v1364_v37, %v364_v36 }
 0x153   : > { %v367_v40 = vadd.f32 %v366_v38, %v365_v39 }
 0x155   : > { %v368_v41 = vpack.c.bf16 %v367_v40, %v367_v40 }
 0x157   : > { %545 = vmatmul.bf16.vlgmr.msra.gmra.mxu0 %v368_v41  ;;  %558 = vmatmul.bf16.vlgmr.msra.gmra.mxu1 %v368_v41 }
 0x158   : > { %571 = vmatmul.bf16.vlgmr.msra.gmra.mxu2 %v368_v41 }
 0x1d4   : > { %v546_v45 = vpop.f32.mrf.mxu0  ;;  %v559_v46 = vpop.f32.mrf.mxu1 }
 0x1d5   : > { %v560_v47 = vadd.f32 %v559_v46, %v404_v43  ;;  %v1794_v10 = vadd.f32 %v546_v45, %v403_v44 }
 0x1d7   : > { %642 = vrot.lane.b32.xlu2 %v560_v47, %s1605_s7  ;;  %1183 = vmatpush.xpose.msk.msra.mxu3 %vm576_vm3, %v560_v47 }
 0x1da   : > { %1184 = vmatmul.msk.f32.vlgmr.msra.gmra.mxu3 %vm576_vm3, %v1794_v10 }
 0x1db   : > { %v572_v49 = vpop.f32.mrf.mxu2 }
 0x1dc   : > { %v1798_v50 = vadd.f32 %v572_v49, %v405_v48  ;;  %v548_v51 = vpop.f32.mrf.mxu0  ;;  %v561_v52 = vpop.f32.mrf.mxu1  ;;  %v1262_v48 = vld [vmem:[#allocation11 + $0x38] sm:$0xff]  ;;  %v1261_v49 = vld [vmem:[#allocation11 + $0x30] sm:$0xff] }
 0x1dd   : > { %923 = vmatpush.bf16.msrb.mxu2 %v1262_v48  ;;  %v1259_v51 = vld [vmem:[#allocation11 + $0x20] sm:$0xff]  ;;  %v1258_v52 = vld [vmem:[#allocation11 + $0x18] sm:$0xff] }
 0x1de   : > { %634 = vmatpush.msrb.mxu3 %v1798_v50 }
 0x1df   : > { %640 = vrot.lane.b32.xlu2 %v1794_v10, %s1605_s7 }
 0x1e1   : > { %924 = vmatpush.bf16.msrb.mxu2 %v1261_v49 }
 0x1e3   : > { %v574_v53 = vpop.f32.mrf.mxu2 }
 0x1e7   : > { %681 = vrot.lane.b32.xlu2 %v1798_v50, %s1605_s7 }
 0x1ef   : > { %787 = vrot.lane.b32.xlu2 %v560_v47, %s1606_s8 }
 0x1f7   : > { %785 = vrot.lane.b32.xlu2 %v1794_v10, %s1606_s8 }
 0x231   : > { %v643_v54 = vpop.permute.xlu2 %642 }
 0x232   : > { %1186 = vmatpush.xpose.msk.msra.mxu3 %vm576_vm3, %v643_v54  ;;  %v1257_v54 = vld [vmem:[#allocation11 + $0x10] sm:$0xff] }
 0x239   : > { %v641_v55 = vpop.permute.xlu2 %640 }
 0x241   : > { %v682_v56 = vpop.permute.xlu2 %681 }
 0x249   : > { %v788_v57 = vpop.permute.xlu2 %787 }
 0x24a   : > { %1192 = vmatpush.xpose.msk.msrb.mxu0 %vm576_vm3, %v788_v57 }
 0x251   : > { %v786_v58 = vpop.permute.xlu2 %785 }
 0x252   : > { %1193 = vmatmul.msk.f32.vlgmr.msrb.gmra.mxu0 %vm576_vm3, %v786_v58 }
 0x25d   : > { %v600_v59 = vpop.f32.mrf.mxu3 }
 0x25e   : > { %v603_v60 = vmul.f32 0.17677669, %v600_v59 }
 0x260   : > { %v605_v61 = vsel %vm604_vm4, %v603_v60, -inf }
 0x261   : > { %606 = vmax.xlane.f32.xlu1 %v605_v61  ;;  %v1358_v61 = vld [vmem:[%s1881_s5] ss:$0 sm:$0xff] }
 0x2cf   : > { %v810_v12 = vpop.f32.mrf.mxu0 }
 0x2d0   : > { %v813_v13 = vmul.f32 0.17677669, %v810_v12 }
 0x2d2   : > { %v814_v14 = vsel %vm604_vm4, %v813_v13, -inf }
 0x2d4   : > { %v607_v62 = vpop.xlane.xlu1 %606 }
 0x2d5   : > { %v608_v63 = vsub.f32 %v603_v60, %v607_v62 }
 0x2d7   : > { %v609_v1 = vmul.f32 1.442695, %v608_v63 }
 0x2d9   : > { %1365 = vpow2.f32 %v609_v1 }
 0x2df   : > { %v1366_v2 = vpop.eup %1365 }
 0x2e0   : > { %v611_v3 = vsel %vm604_vm4, %v1366_v2, 0.0 }
 0x2e1   : > { %612 = vadd.xlane.f32.xlu1 %v611_v3 }
 0x354   : > { %v613_v4 = vpop.xlane.xlu1 %612 }
 0x355   : > { %1367 = vrcp.f32 %v613_v4 }
 0x35b   : > { %v1368_v5 = vpop.eup %1367 }
 0x35c   : > { %v615_v6 = vmul.f32 %v1368_v5, %v1366_v2 }
 0x35e   : > { %1185 = vmatmul.msk.f32.vlgmr.msrb.gmra.mxu3 %vm604_vm4, %v615_v6 }
 0x35f   : > { %702 = vmatpush.msrb.mxu3 %v682_v56  ;;  %v1255_v56 = vld [vmem:[#allocation11] sm:$0xff] }
 0x366   : > { %1187 = vmatmul.msk.f32.vlgmr.msra.gmra.mxu3 %vm576_vm3, %v641_v55  ;;  %v1256_v55 = vld [vmem:[#allocation11 + $0x8] sm:$0xff] }
 0x3e1   : > { %v636_v7 = vpop.f32.mrf.mxu3 }
 0x3e2   : > { %639 = vst.msk [vmem:[#allocation2] sm:$0xff] %vm576_vm3, %v636_v7 }
 0x3e9   : > { %v665_v8 = vpop.f32.mrf.mxu3 }
 0x3ea   : > { %v668_v9 = vmul.f32 0.17677669, %v665_v8 }
 0x3ec   : > { %v669_v11 = vsel %vm604_vm4, %v668_v9, -inf }
 0x3ed   : > { %670 = vmax.xlane.f32.xlu0 %v669_v11 }
 0x401   : > { %715 = vrot.lane.b32.xlu0 %v560_v47, %s1607_s9 }
 0x42b   : > { %815 = vmax.xlane.f32.xlu0 %v814_v14 }
 0x43f   : > { %753 = vrot.lane.b32.xlu0 %v1798_v50, %s1607_s9 }
 0x460   : > { %v671_v15 = vpop.xlane.xlu0 %670 }
 0x461   : > { %v672_v16 = vsub.f32 %v668_v9, %v671_v15 }
 0x463   : > { %v673_v17 = vmul.f32 1.442695, %v672_v16 }
 0x465   : > { %1369 = vpow2.f32 %v673_v17 }
 0x46b   : > { %v1370_v18 = vpop.eup %1369 }
 0x46c   : > { %v675_v19 = vsel %vm604_vm4, %v1370_v18, 0.0 }
 0x46d   : > { %676 = vadd.xlane.f32.xlu1 %v675_v19 }
 0x473   : > { %v716_v20 = vpop.permute.xlu0 %715 }
 0x474   : > { %1189 = vmatpush.xpose.msk.msra.mxu3 %vm576_vm3, %v716_v20 }
 0x486   : > { %713 = vrot.lane.b32.xlu1 %v1794_v10, %s1607_s9 }
 0x49e   : > { %v816_v22 = vpop.xlane.xlu0 %815 }
 0x49f   : > { %v817_v28 = vsub.f32 %v813_v13, %v816_v22 }
 0x4a1   : > { %v818_v29 = vmul.f32 1.442695, %v817_v28 }
 0x4b1   : > { %v754_v25 = vpop.permute.xlu0 %753 }
 0x4e0   : > { %v677_v21 = vpop.xlane.xlu1 %676 }
 0x4e1   : > { %1371 = vrcp.f32 %v677_v21 }
 0x4e2   : > { %1373 = vpow2.f32 %v818_v29 }
 0x4e7   : > { %v1372_v23 = vpop.eup %1371 }
 0x4e8   : > { %v679_v24 = vmul.f32 %v1372_v23, %v1370_v18  ;;  %v1374_v33 = vpop.eup %1373 }
 0x4e9   : > { %v820_v34 = vsel %vm604_vm4, %v1374_v33, 0.0 }
 0x4ea   : > { %1188 = vmatmul.msk.f32.vlgmr.msrb.gmra.mxu3 %vm604_vm4, %v679_v24 }
 0x4eb   : > { %774 = vmatpush.msrb.mxu3 %v754_v25 }
 0x4f8   : > { %v714_v26 = vpop.permute.xlu1 %713 }
 0x4f9   : > { %1190 = vmatmul.msk.f32.vlgmr.msra.gmra.mxu3 %vm576_vm3, %v714_v26 }
 0x56d   : > { %v704_v27 = vpop.f32.mrf.mxu3 }
 0x57c   : > { %v738_v30 = vpop.f32.mrf.mxu3 }
 0x57d   : > { %v741_v31 = vmul.f32 0.17677669, %v738_v30 }
 0x57f   : > { %v742_v32 = vsel %vm604_vm4, %v741_v31, -inf }
 0x580   : > { %743 = vmax.xlane.f32.xlu2 %v742_v32 }
 0x588   : > { %821 = vadd.xlane.f32.xlu2 %v820_v34 }
 0x5a0   : > { %825 = vrot.lane.b32.xlu2 %v1798_v50, %s1606_s8  ;;  %v1260_v50 = vld [vmem:[#allocation11 + $0x28] sm:$0xff] }
 0x5a1   : > { %925 = vmatpush.bf16.msrb.mxu2 %v1260_v50 }
 0x5a5   : > { %926 = vmatpush.bf16.msrb.mxu2 %v1259_v51 }
 0x5a9   : > { %927 = vmatpush.bf16.msrb.mxu2 %v1258_v52 }
 0x5ad   : > { %928 = vmatpush.bf16.msrb.mxu2 %v1257_v54 }
 0x5b1   : > { %929 = vmatpush.bf16.msrb.mxu2 %v1256_v55 }
 0x5b5   : > { %930 = vmatpush.bf16.msrb.mxu2 %v1255_v56 }
 0x5f3   : > { %v744_v35 = vpop.xlane.xlu2 %743 }
 0x5f4   : > { %v745_v36 = vsub.f32 %v741_v31, %v744_v35 }
 0x5f6   : > { %v746_v37 = vmul.f32 1.442695, %v745_v36 }
 0x5f8   : > { %1375 = vpow2.f32 %v746_v37 }
 0x5fb   : > { %v822_v38 = vpop.xlane.xlu2 %821 }
 0x5fc   : > { %1377 = vrcp.f32 %v822_v38 }
 0x5fe   : > { %v1376_v39 = vpop.eup %1375 }
 0x5ff   : > { %v748_v40 = vsel %vm604_vm4, %v1376_v39, 0.0 }
 0x600   : > { %749 = vadd.xlane.f32.xlu1 %v748_v40 }
 0x602   : > { %v1378_v41 = vpop.eup %1377 }
 0x603   : > { %v826_v42 = vpop.permute.xlu2 %825  ;;  %v824_v43 = vmul.f32 %v1378_v41, %v1374_v33 }
 0x604   : > { %846 = vmatpush.msrb.mxu1 %v826_v42 }
 0x605   : > { %1194 = vmatmul.msk.f32.vlgmr.msrb.gmra.mxu1 %vm604_vm4, %v824_v43 }
 0x619   : > { %708 = vrot.lane.b32.xlu1 %v704_v27, %s1606_s8 }
 0x673   : > { %v750_v44 = vpop.xlane.xlu1 %749 }
 0x674   : > { %1379 = vrcp.f32 %v750_v44 }
 0x67a   : > { %v1380_v45 = vpop.eup %1379 }
 0x67b   : > { %v752_v46 = vmul.f32 %v1380_v45, %v1376_v39 }
 0x67d   : > { %1191 = vmatmul.msk.f32.vlgmr.msrb.gmra.mxu3 %vm604_vm4, %v752_v46 }
 0x682   : > { %v848_v47 = vpop.f32.mrf.mxu1 }
 0x683   : > { %852 = vrot.lane.b32.xlu2 %v848_v47, %s1605_s7 }
 0x68b   : > { %v709_v10 = vpop.permute.xlu1 %708 }
 0x68c   : > { %712 = vst.msk [vmem:[#allocation2] sm:$0xff] %vm711_vm5, %v709_v10 }
 0x6dd   : > { %v853_v58 = vpop.permute.xlu2 %852 }
 0x700   : > { %v776_v53 = vpop.f32.mrf.mxu3 }
 0x701   : > { %780 = vrot.lane.b32.xlu0 %v776_v53, %s1607_s9 }
 0x773   : > { %v781_v57 = vpop.permute.xlu0 %780 }
 0x774   : > { %784 = vst.msk [vmem:[#allocation2] sm:$0xff] %vm783_vm6, %v781_v57 }
 0x775   : > { %856 = vst.msk [vmem:[#allocation2] sm:$0xff] %vm855_vm7, %v853_v58 }
 0x77c   : > { %v857_v59 = vld [vmem:[#allocation2] sm:$0xff] }
 0x77d   : > { %v858_v60 = vpack.c.bf16 %v857_v59, %v857_v59 }
 0x77f   : > { %931 = vmatmul.bf16.vlgmr.msrb.gmra.mxu2 %v858_v60 }
 0x802   : > { %v932_v62 = vpop.f32.mrf.mxu2 }
 0x803   : > { %v936_v63 = vadd.f32 %v932_v62, %v1783_v0 }
 0x805   : > { %v941_v1 = vadd.f32 %v1358_v61, %v936_v63 }
 0x807   : > { %942 = vst [vmem:[%s330_s15] sm:$0xff] %v941_v1 }
 0x808   : > { %1543 = shalt.err (!%p1540_p9)
}
 0x809   : > { %1281 = dma.vmem_to_hbm [thread:$0]  (%p1730_p4), %s957_s27, 128, %s959_s30, %s944_s28  }
 0x80a   : > { %v934_v0 = vpop.f32.mrf.mxu2 }
 0x80b PF: > { %s970_s16 = sand.u32 1, %s1582_s21   ;;  %p1892_p10 = scmp.ge.s32.totalorder %s1594_s24, 2 }
 0x80c   : > { %s971_s13 = scalar_lea.sflag [#allocation5], %s970_s16 }
 0x80d   : > { %p1301_p13 = pnand %p1892_p10, %p1734_p6 }
 0x80f   : > { %p1302_p11 = pneg %p1301_p13 }
 0x811   : > { %1577 = dma.done.wait (%p1302_p11), %s971_s13, 128  }
 0x812   : > { %1579 = vsyncadd (%p1302_p11), %s971_s13, 4294967168  ;;  %p22_p0 = scmp.ge.s32.totalorder %s1704_s10, 4   ;;  %s1893_s21 = smov %s1586_s22 }
 0x813   : > { %s1894_s22 = smov %s1590_s23  ;;  %s1895_s23 = smov %s1715_s14 }
 0x814   : > { %s1896_s24 = smov %s1704_s10  ;;  %24 = sbr.rel (!%p22_p0) target bundleno = 10 (0xa), region = 106 }
 0x819   :  { %977 = vsyncpa [#allocation4], 1 }
 0x81a   :  { %979 = vsyncpa [#allocation4 + $0x1], 1 }
 0x81b   :  { %980 = vsyncpa [#allocation9], 1 }
 0x81c   :  { %981 = vsyncpa [#allocation12], 1 }
 0x81d   :  { %982 = vsyncpa [#allocation5], 1 }
 0x81e   :  { %984 = vsyncpa [#allocation5 + $0x1], 1 }
 0x81f   :  { %985 = vsyncpa [#allocation6], 1 }
 0x820   :  { %987 = vsyncpa [#allocation6 + $0x1], 1 }

// kernel: tpu_custom_call.1
= control target key start
LH: loop header
LB: loop body
LE: loop exit
PB: predicated region body
PF: predicated region fallthrough
CT: control target
= control target key end

     0   :  { %s1876_s0 = inlined_call_operand.hbm [shape: f32[2], index: 0, kind: input, shape index: {}]   ;;  %s1877_s1 = inlined_call_operand.hbm [shape: f32[16,128], index: 1, kind: input, shape index: {}]   ;;  %s1878_s2 = inlined_call_operand.hbm [shape: bf16[128,384], index: 2, kind: input, shape index: {}]   ;;  %s1879_s3 = inlined_call_operand.hbm [shape: f32[1,384], index: 3, kind: input, shape index: {}]   ;;  %s1880_s4 = inlined_call_operand.hbm [shape: bf16[128,128], index: 4, kind: input, shape index: {}]   ;;  %s1881_s5 = inlined_call_operand.vmem [shape: f32[1,128], index: 5, kind: input, shape index: {}]   ;;  %s1882_s6 = inlined_call_operand.hbm [shape: f32[16,128], index: 6, kind: output, shape index: {}]  }
   0x1   :  { %1883 = sst [smem:[#allocation19_spill]] %s1876_s0 }
   0x2   :  { %11 = vsyncpa [#allocation6], 0 }
   0x3   :  { %12 = vsyncpa [#allocation4], 0 }
   0x4   :  { %14 = vsyncpa [#allocation4 + $0x1], 0 }
   0x5   :  { %15 = vsyncpa [#allocation9], 0 }
   0x6   :  { %16 = vsyncpa [#allocation12], 0 }
   0x7   :  { %17 = vsyncpa [#allocation5], 0 }
   0x8   :  { %19 = vsyncpa [#allocation5 + $0x1], 0  ;;  %s1643_s21 = smov 0   ;;  %s1645_s22 = smov 0  }
   0x9   :  { %s1647_s23 = smov 0   ;;  %s1649_s24 = smov 0  }
   0xa LB: > { %s208_s27 = sshll.u32 %s1878_s2, 4  ;;  %s1667_s28 = sadd.s32 4294967295, %s1594_s24   ;;  %s1594_s24 = sphi %s1649_s24, %s1896_s24   ;;  %s1590_s23 = sphi %s1647_s23, %s1895_s23   ;;  %s1586_s22 = sphi %s1645_s22, %s1894_s22   ;;  %s1582_s21 = sphi %s1643_s21, %s1893_s21   ;;  %s209_s27 = int_to_ptr.hbm [resolvable:$true] %s208_s27 }
   0xb   : > { %p1071_p0 = scmp.ge.s32.totalorder %s1594_s24, 1  ;;  %p67_p1 = scmp.eq.s32.totalorder %s1667_s28, 0 }
   0xc   : > { %p187_p2 = scmp.lt.s32.totalorder %s1594_s24, 3  ;;  %s1596_s30 = smov [#allocation8]  }
   0xd   : > { %s210_s7 = sshll.u32 %s1596_s30, 4  ;;  %s1885_s0 = sld [smem:[#allocation19_spill]]  ;;  %s211_s7 = int_to_ptr.vmem [resolvable:$true] %s210_s7 }
   0xe   : > { %p1672_p3 = pnand %p1071_p0, %p187_p2  ;;  %s223_s14 = sshll.u32 %s1879_s3, 4  ;;  %s224_s14 = int_to_ptr.hbm [resolvable:$true] %s223_s14 }
   0xf   : > { %s1597_s15 = smov 192   ;;  %s1598_s16 = smov 12  }
  0x10   : > { %p1283_p4 = pneg %p1672_p3  ;;  %s1599_s17 = smov [#allocation3]  }
  0x11   : > { %s234_s20 = sshll.u32 %s1880_s4, 4  ;;  %s1600_s25 = smov [#allocation10]   ;;  %s235_s20 = int_to_ptr.hbm [resolvable:$true] %s234_s20 }
  0x12   : > { %p1684_p6 = pnand %p1283_p4, %p67_p1  ;;  %s225_s26 = sshll.u32 %s1600_s25, 4  ;;  %s226_s26 = int_to_ptr.vmem [resolvable:$true] %s225_s26 }
  0x13   : > { %s199_s10 = sshll.u32 %s1885_s0, 4  ;;  %s1603_s8 = smov 4   ;;  %s200_s10 = int_to_ptr.hbm [resolvable:$true] %s199_s10 }
  0x14   : > { %1289 = dma.hbm_to_vmem [thread:$0]  (!%p1684_p6), %s209_s27, 3072, %s211_s7, [#allocation9], %s1597_s15, %s1597_s15, %s1598_s16  }
  0x15   : > { %1286 = dma.hbm_to_smem (!%p1684_p6), %s200_s10, 16, %s1599_s17, [#allocation6]  }
  0x16   : > { %1292 = dma.hbm_to_vmem [thread:$0]  (!%p1684_p6), %s224_s14, 48, %s226_s26, [#allocation9]  }
  0x17   : > { %s1601_s27 = smov [#allocation11]   ;;  %s1602_s7 = smov 64  }
  0x18   : > { %s236_s30 = sshll.u32 %s1601_s27, 4  ;;  %s1070_s9 = sadd.s32 4294967294, %s1594_s24   ;;  %s237_s30 = int_to_ptr.vmem [resolvable:$true] %s236_s30 }
  0x19   : > { %1295 = dma.hbm_to_vmem [thread:$0]  (!%p1684_p6), %s235_s20, 1024, %s237_s30, [#allocation12], %s1602_s7, %s1602_s7, %s1603_s8  }
  0x1a   : > { %s1704_s10 = sadd.s32 1, %s1594_s24   ;;  %s53_s13 = sadd.s32 1, %s1590_s23 }
  0x1b   : > { %s50_s12 = ssub.s32 %s1594_s24, %s1704_s10  ;;  %p60_p8 = scmp.ne.s32.totalorder %s1590_s23, %s1586_s22 }
  0x1c   : > { %p51_p7 = scmp.eq.s32.totalorder %s50_s12, 0  ;;  %p61_p9 = scmp.eq.s32.totalorder %s1594_s24, 0 }
  0x1d   : > { %p66_p10 = scmp.ne.s32.totalorder %s1586_s22, %s1582_s21  ;;  %p174_p13 = scmp.eq.s32.totalorder %s1667_s28, 1 }
  0x1e   : > { %s1715_s14 = scalar_select %p51_p7, %s1590_s23, %s53_s13  }
  0x1f   : > { %p1717_p11 = por %p61_p9, %p60_p8  ;;  %p1723_p12 = por %p67_p1, %p66_p10 }
  0x20   : > { %p180_p0 = scmp.eq.s32.totalorder %s1070_s9, 1  ;;  %p1308_p2 = scmp.lt.s32.totalorder %s1594_s24, 2 }
  0x21   : > { %s253_s16 = sand.u32 1, %s1590_s23   ;;  %p1730_p4 = por %p174_p13, %p60_p8 }
  0x22   : > { %p1734_p6 = por %p180_p0, %p66_p10  ;;  %s1077_s19 = sshll.u32 %s253_s16, 3 }
  0x23   : > { %s1078_s20 = sshll.u32 %s1594_s24, 3  ;;  %s257_s30 = scalar_lea.vmem [#allocation7], %s1077_s19 }
  0x24   : > { %s261_s27 = scalar_lea.hbm %s1877_s1, %s1078_s20  ;;  %s265_s7 = sshll.u32 %s257_s30, 4  ;;  %s266_s7 = int_to_ptr.vmem [resolvable:$true] %s265_s7 }
  0x25   : > { %s263_s8 = sshll.u32 %s261_s27, 4  ;;  %p1744_p7 = pnand %p1308_p2, %p1717_p11  ;;  %s264_s8 = int_to_ptr.hbm [resolvable:$true] %s263_s8 }
  0x26   : > { %s254_s12 = scalar_lea.sflag [#allocation4], %s253_s16  ;;  %s1486_s13 = sshra.s32 %s264_s8, 4  ;;  %s1487_s13 = int_to_ptr.hbm [resolvable:$true] %s1486_s13 }
  0x27   : > { %s1488_s0 = scalar_lea.hbm %s1487_s13, 8  ;;  %p1490_p9 = pneg %p1744_p7 }
  0x28   : > { %p1489_p8 = scmp.ne.s32.totalorder %s1487_s13, %s1488_s0  ;;  %s1493_s25 = scalar_lea.hbm %s1877_s1, 16 }
  0x29   : > { %p1494_p11 = scmp.lt.s32.totalorder %s1487_s13, %s1877_s1  ;;  %p1495_p0 = scmp.lt.s32.totalorder %s1493_s25, %s1488_s0 }
  0x2a   : > { %p1491_p10 = pnand %p1490_p9, %p1489_p8 }
  0x2b   : > { %p1496_p2 = por %p1495_p0, %p1494_p11 }
  0x2c   : > { %p1492_p13 = pneg %p1491_p10 }
  0x2e   : > { %p1497_p5 = pnand %p1496_p2, %p1492_p13 }
  0x30   : > { %1500 = shalt.err (!%p1497_p5)
}
  0x31   : > { %1299 = dma.hbm_to_vmem [thread:$0]  (!%p1744_p7), %s264_s8, 128, %s266_s7, %s254_s12  }
  0x32   : > { %274 = sbr.rel (%p1672_p3) target bundleno = 2059 (0x80b), region = 44 }
  0x37   : > { %1561 = dma.done.wait (%p67_p1), [#allocation6], 16  }
  0x38   : > { %1563 = vsyncadd (%p67_p1), [#allocation6], 4294967280  ;;  %s1765_s16 = sand.u32 1, %s1586_s22  }
  0x39   : > { %s1081_s0 = sshll.u32 %s1765_s16, 3  ;;  %s282_s27 = scalar_lea.sflag [#allocation4], %s1765_s16 }
  0x3a   : > { %s285_s30 = scalar_lea.vmem [#allocation7], %s1081_s0 }
  0x3b   : > { %1565 = dma.done.wait (%p1723_p12), %s282_s27, 128  }
  0x3c   : > { %1567 = vsyncadd (%p1723_p12), %s282_s27, 4294967168 }
  0x3d   : > { %1569 = dma.done.wait (%p67_p1), [#allocation9], 3120  }
  0x3e   : > { %1571 = vsyncadd (%p67_p1), [#allocation9], 4294964176 }
  0x3f   : > { %1573 = dma.done.wait (%p67_p1), [#allocation12], 1024  }
  0x40   : > { %1575 = vsyncadd (%p67_p1), [#allocation12], 4294966272 }
  0x41   : > { %306 = sfence }
  0x42   : > { %v1783_v0 = vld [vmem:[%s285_s30] sm:$0xff]  ;;  %v1604_v1 = vmov 128.0   ;;  %v1173_v12 = vld [vmem:[#allocation8 + $0xa8] sm:$0xf]  ;;  %v1252_v14 = vld [vmem:[#allocation8 + $0xac] sm:$0xf] }
  0x43   : > { %334 = vadd.xlane.f32.xlu0 %v1783_v0  ;;  %1359 = vrcp.f32 %v1604_v1  ;;  %v1253_v13 = vld [vmem:[#allocation8 + $0xb0] sm:$0xf0]  ;;  %v1175_v16 = vld [vmem:[#allocation8 + $0xb4] sm:$0xf0]  ;;  %v1181_v17 = vld [vmem:[#allocation8 + $0xb0] sm:$0xf] }
  0x44   : > { %v1174_v15 = vor.u32 %v1253_v13, %v1173_v12  ;;  %v1254_v18 = vld [vmem:[#allocation8 + $0xb8] sm:$0xf0]  ;;  %v1178_v19 = vor.u32 %v1252_v14, %v1175_v16  ;;  %v1161_v21 = vld [vmem:[#allocation8 + $0x90] sm:$0xf]  ;;  %v1249_v23 = vld [vmem:[#allocation8 + $0x94] sm:$0xf] }
  0x45   : > { %v1182_v20 = vor.u32 %v1254_v18, %v1181_v17  ;;  %v1250_v22 = vld [vmem:[#allocation8 + $0x98] sm:$0xf0]  ;;  %v1163_v25 = vld [vmem:[#allocation8 + $0x9c] sm:$0xf0]  ;;  %v1169_v26 = vld [vmem:[#allocation8 + $0x98] sm:$0xf] }
  0x46   : > { %537 = vmatpush.bf16.msra.mxu0 %v1174_v15  ;;  %550 = vmatpush.bf16.msra.mxu1 %v1178_v19  ;;  %v1162_v24 = vor.u32 %v1250_v22, %v1161_v21  ;;  %v1251_v27 = vld [vmem:[#allocation8 + $0xa0] sm:$0xf0]  ;;  %v1166_v28 = vor.u32 %v1249_v23, %v1163_v25  ;;  %v1149_v30 = vld [vmem:[#allocation8 + $0x78] sm:$0xf]  ;;  %v1246_v32 = vld [vmem:[#allocation8 + $0x7c] sm:$0xf] }
  0x47   : > { %563 = vmatpush.bf16.msra.mxu2 %v1182_v20  ;;  %v1170_v29 = vor.u32 %v1251_v27, %v1169_v26  ;;  %v1247_v31 = vld [vmem:[#allocation8 + $0x80] sm:$0xf0]  ;;  %v1151_v34 = vld [vmem:[#allocation8 + $0x84] sm:$0xf0]  ;;  %v1157_v35 = vld [vmem:[#allocation8 + $0x80] sm:$0xf] }
  0x48   : > { %v1150_v33 = vor.u32 %v1247_v31, %v1149_v30  ;;  %v1248_v36 = vld [vmem:[#allocation8 + $0x88] sm:$0xf0]  ;;  %v1154_v37 = vor.u32 %v1246_v32, %v1151_v34  ;;  %v1137_v39 = vld [vmem:[#allocation8 + $0x60] sm:$0xf]  ;;  %v1243_v41 = vld [vmem:[#allocation8 + $0x64] sm:$0xf] }
  0x49   : > { %v1360_v2 = vpop.eup %1359  ;;  %v1158_v38 = vor.u32 %v1248_v36, %v1157_v35  ;;  %v1244_v40 = vld [vmem:[#allocation8 + $0x68] sm:$0xf0]  ;;  %v1139_v42 = vld [vmem:[#allocation8 + $0x6c] sm:$0xf0]  ;;  %v1145_v43 = vld [vmem:[#allocation8 + $0x68] sm:$0xf] }
  0x4a   : > { %v337_v3 = vmul.f32 128.0, %v1360_v2  ;;  %vm341_vm0 = vweird.f32 %v1360_v2  ;;  %538 = vmatpush.bf16.msra.mxu0 %v1162_v24  ;;  %551 = vmatpush.bf16.msra.mxu1 %v1166_v28  ;;  %v1245_v44 = vld [vmem:[#allocation8 + $0x70] sm:$0xf0]  ;;  %v1138_v45 = vor.u32 %v1244_v40, %v1137_v39  ;;  %v1142_v46 = vor.u32 %v1243_v41, %v1139_v42  ;;  %v1125_v48 = vld [vmem:[#allocation8 + $0x48] sm:$0xf]  ;;  %s331_s29 = sld [smem:[#allocation3]] }
  0x4b   : > { %564 = vmatpush.bf16.msra.mxu2 %v1170_v29  ;;  %v1146_v47 = vor.u32 %v1245_v44, %v1145_v43  ;;  %v1241_v49 = vld [vmem:[#allocation8 + $0x50] sm:$0xf0]  ;;  %v1240_v50 = vld [vmem:[#allocation8 + $0x4c] sm:$0xf]  ;;  %v1127_v51 = vld [vmem:[#allocation8 + $0x54] sm:$0xf0] }
  0x4c   : > { %v338_v4 = vsub.f32 1.0, %v337_v3  ;;  %v1133_v52 = vld [vmem:[#allocation8 + $0x50] sm:$0xf]  ;;  %v1242_v53 = vld [vmem:[#allocation8 + $0x58] sm:$0xf0]  ;;  %v1126_v54 = vor.u32 %v1241_v49, %v1125_v48  ;;  %v1130_v55 = vor.u32 %v1240_v50, %v1127_v51  ;;  %s1086_s11 = sld [smem:[#allocation3 + $0x1]] }
  0x4d   : > { %v1134_v56 = vor.u32 %v1242_v53, %v1133_v52  ;;  %v1113_v57 = vld [vmem:[#allocation8 + $0x30] sm:$0xf]  ;;  %v1238_v58 = vld [vmem:[#allocation8 + $0x38] sm:$0xf0]  ;;  %v1237_v59 = vld [vmem:[#allocation8 + $0x34] sm:$0xf] }
  0x4e   : > { %v339_v5 = vmul.f32 %v1360_v2, %v338_v4  ;;  %539 = vmatpush.bf16.msra.mxu0 %v1150_v33  ;;  %552 = vmatpush.bf16.msra.mxu1 %v1154_v37  ;;  %v1115_v60 = vld [vmem:[#allocation8 + $0x3c] sm:$0xf0]  ;;  %v1121_v61 = vld [vmem:[#allocation8 + $0x38] sm:$0xf]  ;;  %v1239_v62 = vld [vmem:[#allocation8 + $0x40] sm:$0xf0]  ;;  %v1114_v63 = vor.u32 %v1238_v58, %v1113_v57 }
  0x4f   : > { %565 = vmatpush.bf16.msra.mxu2 %v1158_v38  ;;  %v1118_v1 = vor.u32 %v1237_v59, %v1115_v60  ;;  %v1101_v3 = vld [vmem:[#allocation8 + $0x18] sm:$0xf]  ;;  %v1235_v4 = vld [vmem:[#allocation8 + $0x20] sm:$0xf0]  ;;  %v1089_v13 = vld [vmem:[#allocation8] sm:$0xf] }
  0x50   : > { %v340_v6 = vadd.f32 %v1360_v2, %v339_v5  ;;  %v1234_v5 = vld [vmem:[#allocation8 + $0x1c] sm:$0xf]  ;;  %v1232_v14 = vld [vmem:[#allocation8 + $0x8] sm:$0xf0]  ;;  %v1231_v15 = vld [vmem:[#allocation8 + $0x4] sm:$0xf]  ;;  %v363_v35 = vstv %s331_s29 }
  0x51   : > { %v1091_v16 = vld [vmem:[#allocation8 + $0xc] sm:$0xf0]  ;;  %v1097_v17 = vld [vmem:[#allocation8 + $0x8] sm:$0xf]  ;;  %v1233_v18 = vld [vmem:[#allocation8 + $0x10] sm:$0xf0]  ;;  %v1090_v20 = vor.u32 %v1232_v14, %v1089_v13 }
  0x52   : > { %v342_v7 = vsel %vm341_vm0, %v1360_v2, %v340_v6  ;;  %540 = vmatpush.bf16.msra.mxu0 %v1138_v45  ;;  %553 = vmatpush.bf16.msra.mxu1 %v1142_v46  ;;  %v1122_v2 = vor.u32 %v1239_v62, %v1121_v61  ;;  %v1103_v6 = vld [vmem:[#allocation8 + $0x24] sm:$0xf0]  ;;  %v1094_v22 = vor.u32 %v1231_v15, %v1091_v16  ;;  %v366_v38 = vstv %s1086_s11  ;;  %v401_v42 = vld [vmem:[#allocation10] sm:$0x7]  ;;  %s1605_s7 = smov 96   ;;  %s1606_s8 = smov 32  }
  0x53   : > { %566 = vmatpush.bf16.msra.mxu2 %v1146_v47  ;;  %v1098_v23 = vor.u32 %v1233_v18, %v1097_v17  ;;  %v404_v43 = vperm.slane %v401_v42, 1  ;;  %v403_v44 = vperm.slane %v401_v42, 0  ;;  %vm576_vm3 = vcmask 261120   ;;  %s1607_s9 = smov 64   ;;  %s1228_s12 = sshll.u32 %s1667_s28, 3 }
  0x54   : > { %v405_v48 = vperm.slane %v401_v42, 2  ;;  %vm604_vm4 = vcmask 64512   ;;  %vm711_vm5 = vcmask 523520   ;;  %vm783_vm6 = vcmask 785920   ;;  %s954_s20 = scalar_lea.hbm %s1882_s6, %s1228_s12  ;;  %s330_s15 = scalar_lea.vmem [#allocation13], %s1081_s0 }
  0x55   : > { %vm855_vm7 = vcmask 1048320   ;;  %s956_s27 = sshll.u32 %s330_s15, 4  ;;  %s958_s30 = sshll.u32 %s954_s20, 4  ;;  %s957_s27 = int_to_ptr.vmem [resolvable:$true] %s956_s27  ;;  %s959_s30 = int_to_ptr.hbm [resolvable:$true] %s958_s30 }
  0x56   : > { %541 = vmatpush.bf16.msra.mxu0 %v1126_v54  ;;  %554 = vmatpush.bf16.msra.mxu1 %v1130_v55  ;;  %s944_s28 = scalar_lea.sflag [#allocation5], %s1765_s16  ;;  %s1530_s29 = sshra.s32 %s959_s30, 4  ;;  %s1531_s29 = int_to_ptr.hbm [resolvable:$true] %s1530_s29 }
  0x57   : > { %567 = vmatpush.bf16.msra.mxu2 %v1134_v56  ;;  %s1532_s11 = scalar_lea.hbm %s1531_s29, 8  ;;  %s1536_s0 = scalar_lea.hbm %s1882_s6, 16 }
  0x58   : > { %p1533_p1 = scmp.ne.s32.totalorder %s1531_s29, %s1532_s11  ;;  %p1537_p12 = scmp.lt.s32.totalorder %s1531_s29, %s1882_s6 }
  0x59   : > { %p1538_p7 = scmp.lt.s32.totalorder %s1536_s0, %s1532_s11 }
  0x5a   : > { %542 = vmatpush.bf16.msra.mxu0 %v1114_v63  ;;  %555 = vmatpush.bf16.msra.mxu1 %v1118_v1  ;;  %p1534_p3 = pnand %p1533_p1, %p1730_p4 }
  0x5b   : > { %568 = vmatpush.bf16.msra.mxu2 %v1122_v2  ;;  %p1539_p8 = por %p1538_p7, %p1537_p12 }
  0x5c   : > { %p1535_p5 = pneg %p1534_p3 }
  0x5e   : > { %p1540_p9 = pnand %p1539_p8, %p1535_p5 }
  0xb6   : > { %v335_v8 = vpop.xlane.xlu0 %334 }
  0xb7   : > { %v343_v9 = vmul.f32 %v342_v7, %v335_v8  ;;  %v1109_v7 = vld [vmem:[#allocation8 + $0x20] sm:$0xf]  ;;  %v1236_v8 = vld [vmem:[#allocation8 + $0x28] sm:$0xf0] }
  0xb8   : > { %v1110_v12 = vor.u32 %v1236_v8, %v1109_v7 }
  0xb9   : > { %v1787_v10 = vsub.f32 %v1783_v0, %v343_v9  ;;  %v1102_v9 = vor.u32 %v1235_v4, %v1101_v3 }
  0xba   : > { %569 = vmatpush.bf16.msra.mxu2 %v1110_v12 }
  0xbb   : > { %v345_v11 = vmul.f32 %v1787_v10, %v1787_v10  ;;  %543 = vmatpush.bf16.msra.mxu0 %v1102_v9  ;;  %v364_v36 = vmul.f32 %v363_v35, %v1787_v10 }
  0xbd   : > { %346 = vadd.xlane.f32.xlu0 %v345_v11  ;;  %v1106_v11 = vor.u32 %v1234_v5, %v1103_v6 }
  0xbe   : > { %570 = vmatpush.bf16.msra.mxu2 %v1098_v23 }
  0xbf   : > { %556 = vmatpush.bf16.msra.mxu1 %v1106_v11  ;;  %544 = vmatpush.bf16.msra.mxu0 %v1090_v20 }
  0xc3   : > { %557 = vmatpush.bf16.msra.mxu1 %v1094_v22 }
 0x130   : > { %v347_v19 = vpop.xlane.xlu0 %346 }
 0x131   : > { %v348_v21 = vmul.f32 0.007874016, %v347_v19 }
 0x133   : > { %1361 = vrsqrt.f32 %v348_v21  ;;  %vm356_vm1 = vcmp.eq.f32.partialorder %v348_v21, inf  ;;  %v359_v31 = vand.u32 2147483648, %v348_v21  ;;  %vm358_vm2 = vcmp.eq.f32.partialorder %v348_v21, 0.0 }
 0x139   : > { %v1362_v24 = vpop.eup %1361 }
 0x13a   : > { %v350_v25 = vmul.f32 %v1362_v24, %v348_v21 }
 0x13c   : > { %v351_v26 = vmul.f32 %v1362_v24, %v350_v25 }
 0x13e   : > { %v352_v27 = vmul.f32 0.5, %v351_v26 }
 0x140   : > { %v353_v28 = vsub.f32 1.5, %v352_v27 }
 0x142   : > { %v354_v29 = vmul.f32 %v1362_v24, %v353_v28 }
 0x144   : > { %v355_v30 = vmul.f32 %v354_v29, %v348_v21 }
 0x146   : > { %v357_v32 = vsel %vm356_vm1, %v348_v21, %v355_v30 }
 0x147   : > { %v360_v33 = vsel %vm358_vm2, %v359_v31, %v357_v32 }
 0x148   : > { %v361_v34 = vadd.f32 1e-06, %v360_v33 }
 0x14a   : > { %1363 = vrcp.f32 %v361_v34 }
 0x150   : > { %v1364_v37 = vpop.eup %1363 }
 0x151   : > { %v365_v39 = vmul.f32 %v1364_v37, %v364_v36 }
 0x153   : > { %v367_v40 = vadd.f32 %v366_v38, %v365_v39 }
 0x155   : > { %v368_v41 = vpack.c.bf16 %v367_v40, %v367_v40 }
 0x157   : > { %545 = vmatmul.bf16.vlgmr.msra.gmra.mxu0 %v368_v41  ;;  %558 = vmatmul.bf16.vlgmr.msra.gmra.mxu1 %v368_v41 }
 0x158   : > { %571 = vmatmul.bf16.vlgmr.msra.gmra.mxu2 %v368_v41 }
 0x1d4   : > { %v546_v45 = vpop.f32.mrf.mxu0  ;;  %v559_v46 = vpop.f32.mrf.mxu1 }
 0x1d5   : > { %v560_v47 = vadd.f32 %v559_v46, %v404_v43  ;;  %v1794_v10 = vadd.f32 %v546_v45, %v403_v44 }
 0x1d7   : > { %642 = vrot.lane.b32.xlu2 %v560_v47, %s1605_s7  ;;  %1183 = vmatpush.xpose.msk.msra.mxu3 %vm576_vm3, %v560_v47 }
 0x1da   : > { %1184 = vmatmul.msk.f32.vlgmr.msra.gmra.mxu3 %vm576_vm3, %v1794_v10 }
 0x1db   : > { %v572_v49 = vpop.f32.mrf.mxu2 }
 0x1dc   : > { %v1798_v50 = vadd.f32 %v572_v49, %v405_v48  ;;  %v548_v51 = vpop.f32.mrf.mxu0  ;;  %v561_v52 = vpop.f32.mrf.mxu1  ;;  %v1262_v48 = vld [vmem:[#allocation11 + $0x38] sm:$0xff]  ;;  %v1261_v49 = vld [vmem:[#allocation11 + $0x30] sm:$0xff] }
 0x1dd   : > { %923 = vmatpush.bf16.msrb.mxu2 %v1262_v48  ;;  %v1259_v51 = vld [vmem:[#allocation11 + $0x20] sm:$0xff]  ;;  %v1258_v52 = vld [vmem:[#allocation11 + $0x18] sm:$0xff] }
 0x1de   : > { %634 = vmatpush.msrb.mxu3 %v1798_v50 }
 0x1df   : > { %640 = vrot.lane.b32.xlu2 %v1794_v10, %s1605_s7 }
 0x1e1   : > { %924 = vmatpush.bf16.msrb.mxu2 %v1261_v49 }
 0x1e3   : > { %v574_v53 = vpop.f32.mrf.mxu2 }
 0x1e7   : > { %681 = vrot.lane.b32.xlu2 %v1798_v50, %s1605_s7 }
 0x1ef   : > { %787 = vrot.lane.b32.xlu2 %v560_v47, %s1606_s8 }
 0x1f7   : > { %785 = vrot.lane.b32.xlu2 %v1794_v10, %s1606_s8 }
 0x231   : > { %v643_v54 = vpop.permute.xlu2 %642 }
 0x232   : > { %1186 = vmatpush.xpose.msk.msra.mxu3 %vm576_vm3, %v643_v54  ;;  %v1257_v54 = vld [vmem:[#allocation11 + $0x10] sm:$0xff] }
 0x239   : > { %v641_v55 = vpop.permute.xlu2 %640 }
 0x241   : > { %v682_v56 = vpop.permute.xlu2 %681 }
 0x249   : > { %v788_v57 = vpop.permute.xlu2 %787 }
 0x24a   : > { %1192 = vmatpush.xpose.msk.msrb.mxu0 %vm576_vm3, %v788_v57 }
 0x251   : > { %v786_v58 = vpop.permute.xlu2 %785 }
 0x252   : > { %1193 = vmatmul.msk.f32.vlgmr.msrb.gmra.mxu0 %vm576_vm3, %v786_v58 }
 0x25d   : > { %v600_v59 = vpop.f32.mrf.mxu3 }
 0x25e   : > { %v603_v60 = vmul.f32 0.17677669, %v600_v59 }
 0x260   : > { %v605_v61 = vsel %vm604_vm4, %v603_v60, -inf }
 0x261   : > { %606 = vmax.xlane.f32.xlu1 %v605_v61  ;;  %v1358_v61 = vld [vmem:[%s1881_s5] ss:$0 sm:$0xff] }
 0x2cf   : > { %v810_v12 = vpop.f32.mrf.mxu0 }
 0x2d0   : > { %v813_v13 = vmul.f32 0.17677669, %v810_v12 }
 0x2d2   : > { %v814_v14 = vsel %vm604_vm4, %v813_v13, -inf }
 0x2d4   : > { %v607_v62 = vpop.xlane.xlu1 %606 }
 0x2d5   : > { %v608_v63 = vsub.f32 %v603_v60, %v607_v62 }
 0x2d7   : > { %v609_v1 = vmul.f32 1.442695, %v608_v63 }
 0x2d9   : > { %1365 = vpow2.f32 %v609_v1 }
 0x2df   : > { %v1366_v2 = vpop.eup %1365 }
 0x2e0   : > { %v611_v3 = vsel %vm604_vm4, %v1366_v2, 0.0 }
 0x2e1   : > { %612 = vadd.xlane.f32.xlu1 %v611_v3 }
 0x354   : > { %v613_v4 = vpop.xlane.xlu1 %612 }
 0x355   : > { %1367 = vrcp.f32 %v613_v4 }
 0x35b   : > { %v1368_v5 = vpop.eup %1367 }
 0x35c   : > { %v615_v6 = vmul.f32 %v1368_v5, %v1366_v2 }
 0x35e   : > { %1185 = vmatmul.msk.f32.vlgmr.msrb.gmra.mxu3 %vm604_vm4, %v615_v6 }
 0x35f   : > { %702 = vmatpush.msrb.mxu3 %v682_v56  ;;  %v1255_v56 = vld [vmem:[#allocation11] sm:$0xff] }
 0x366   : > { %1187 = vmatmul.msk.f32.vlgmr.msra.gmra.mxu3 %vm576_vm3, %v641_v55  ;;  %v1256_v55 = vld [vmem:[#allocation11 + $0x8] sm:$0xff] }
 0x3e1   : > { %v636_v7 = vpop.f32.mrf.mxu3 }
 0x3e2   : > { %639 = vst.msk [vmem:[#allocation2] sm:$0xff] %vm576_vm3, %v636_v7 }
 0x3e9   : > { %v665_v8 = vpop.f32.mrf.mxu3 }
 0x3ea   : > { %v668_v9 = vmul.f32 0.17677669, %v665_v8 }
 0x3ec   : > { %v669_v11 = vsel %vm604_vm4, %v668_v9, -inf }
 0x3ed   : > { %670 = vmax.xlane.f32.xlu0 %v669_v11 }
 0x401   : > { %715 = vrot.lane.b32.xlu0 %v560_v47, %s1607_s9 }
 0x42b   : > { %815 = vmax.xlane.f32.xlu0 %v814_v14 }
 0x43f   : > { %753 = vrot.lane.b32.xlu0 %v1798_v50, %s1607_s9 }
 0x460   : > { %v671_v15 = vpop.xlane.xlu0 %670 }
 0x461   : > { %v672_v16 = vsub.f32 %v668_v9, %v671_v15 }
 0x463   : > { %v673_v17 = vmul.f32 1.442695, %v672_v16 }
 0x465   : > { %1369 = vpow2.f32 %v673_v17 }
 0x46b   : > { %v1370_v18 = vpop.eup %1369 }
 0x46c   : > { %v675_v19 = vsel %vm604_vm4, %v1370_v18, 0.0 }
 0x46d   : > { %676 = vadd.xlane.f32.xlu1 %v675_v19 }
 0x473   : > { %v716_v20 = vpop.permute.xlu0 %715 }
 0x474   : > { %1189 = vmatpush.xpose.msk.msra.mxu3 %vm576_vm3, %v716_v20 }
 0x486   : > { %713 = vrot.lane.b32.xlu1 %v1794_v10, %s1607_s9 }
 0x49e   : > { %v816_v22 = vpop.xlane.xlu0 %815 }
 0x49f   : > { %v817_v28 = vsub.f32 %v813_v13, %v816_v22 }
 0x4a1   : > { %v818_v29 = vmul.f32 1.442695, %v817_v28 }
 0x4b1   : > { %v754_v25 = vpop.permute.xlu0 %753 }
 0x4e0   : > { %v677_v21 = vpop.xlane.xlu1 %676 }
 0x4e1   : > { %1371 = vrcp.f32 %v677_v21 }
 0x4e2   : > { %1373 = vpow2.f32 %v818_v29 }
 0x4e7   : > { %v1372_v23 = vpop.eup %1371 }
 0x4e8   : > { %v679_v24 = vmul.f32 %v1372_v23, %v1370_v18  ;;  %v1374_v33 = vpop.eup %1373 }
 0x4e9   : > { %v820_v34 = vsel %vm604_vm4, %v1374_v33, 0.0 }
 0x4ea   : > { %1188 = vmatmul.msk.f32.vlgmr.msrb.gmra.mxu3 %vm604_vm4, %v679_v24 }
 0x4eb   : > { %774 = vmatpush.msrb.mxu3 %v754_v25 }
 0x4f8   : > { %v714_v26 = vpop.permute.xlu1 %713 }
 0x4f9   : > { %1190 = vmatmul.msk.f32.vlgmr.msra.gmra.mxu3 %vm576_vm3, %v714_v26 }
 0x56d   : > { %v704_v27 = vpop.f32.mrf.mxu3 }
 0x57c   : > { %v738_v30 = vpop.f32.mrf.mxu3 }
 0x57d   : > { %v741_v31 = vmul.f32 0.17677669, %v738_v30 }
 0x57f   : > { %v742_v32 = vsel %vm604_vm4, %v741_v31, -inf }
 0x580   : > { %743 = vmax.xlane.f32.xlu2 %v742_v32 }
 0x588   : > { %821 = vadd.xlane.f32.xlu2 %v820_v34 }
 0x5a0   : > { %825 = vrot.lane.b32.xlu2 %v1798_v50, %s1606_s8  ;;  %v1260_v50 = vld [vmem:[#allocation11 + $0x28] sm:$0xff] }
 0x5a1   : > { %925 = vmatpush.bf16.msrb.mxu2 %v1260_v50 }
 0x5a5   : > { %926 = vmatpush.bf16.msrb.mxu2 %v1259_v51 }
 0x5a9   : > { %927 = vmatpush.bf16.msrb.mxu2 %v1258_v52 }
 0x5ad   : > { %928 = vmatpush.bf16.msrb.mxu2 %v1257_v54 }
 0x5b1   : > { %929 = vmatpush.bf16.msrb.mxu2 %v1256_v55 }
 0x5b5   : > { %930 = vmatpush.bf16.msrb.mxu2 %v1255_v56 }
 0x5f3   : > { %v744_v35 = vpop.xlane.xlu2 %743 }
 0x5f4   : > { %v745_v36 = vsub.f32 %v741_v31, %v744_v35 }
 0x5f6   : > { %v746_v37 = vmul.f32 1.442695, %v745_v36 }
 0x5f8   : > { %1375 = vpow2.f32 %v746_v37 }
 0x5fb   : > { %v822_v38 = vpop.xlane.xlu2 %821 }
 0x5fc   : > { %1377 = vrcp.f32 %v822_v38 }
 0x5fe   : > { %v1376_v39 = vpop.eup %1375 }
 0x5ff   : > { %v748_v40 = vsel %vm604_vm4, %v1376_v39, 0.0 }
 0x600   : > { %749 = vadd.xlane.f32.xlu1 %v748_v40 }
 0x602   : > { %v1378_v41 = vpop.eup %1377 }
 0x603   : > { %v826_v42 = vpop.permute.xlu2 %825  ;;  %v824_v43 = vmul.f32 %v1378_v41, %v1374_v33 }
 0x604   : > { %846 = vmatpush.msrb.mxu1 %v826_v42 }
 0x605   : > { %1194 = vmatmul.msk.f32.vlgmr.msrb.gmra.mxu1 %vm604_vm4, %v824_v43 }
 0x619   : > { %708 = vrot.lane.b32.xlu1 %v704_v27, %s1606_s8 }
 0x673   : > { %v750_v44 = vpop.xlane.xlu1 %749 }
 0x674   : > { %1379 = vrcp.f32 %v750_v44 }
 0x67a   : > { %v1380_v45 = vpop.eup %1379 }
 0x67b   : > { %v752_v46 = vmul.f32 %v1380_v45, %v1376_v39 }
 0x67d   : > { %1191 = vmatmul.msk.f32.vlgmr.msrb.gmra.mxu3 %vm604_vm4, %v752_v46 }
 0x682   : > { %v848_v47 = vpop.f32.mrf.mxu1 }
 0x683   : > { %852 = vrot.lane.b32.xlu2 %v848_v47, %s1605_s7 }
 0x68b   : > { %v709_v10 = vpop.permute.xlu1 %708 }
 0x68c   : > { %712 = vst.msk [vmem:[#allocation2] sm:$0xff] %vm711_vm5, %v709_v10 }
 0x6dd   : > { %v853_v58 = vpop.permute.xlu2 %852 }
 0x700   : > { %v776_v53 = vpop.f32.mrf.mxu3 }
 0x701   : > { %780 = vrot.lane.b32.xlu0 %v776_v53, %s1607_s9 }
 0x773   : > { %v781_v57 = vpop.permute.xlu0 %780 }
 0x774   : > { %784 = vst.msk [vmem:[#allocation2] sm:$0xff] %vm783_vm6, %v781_v57 }
 0x775   : > { %856 = vst.msk [vmem:[#allocation2] sm:$0xff] %vm855_vm7, %v853_v58 }
 0x77c   : > { %v857_v59 = vld [vmem:[#allocation2] sm:$0xff] }
 0x77d   : > { %v858_v60 = vpack.c.bf16 %v857_v59, %v857_v59 }
 0x77f   : > { %931 = vmatmul.bf16.vlgmr.msrb.gmra.mxu2 %v858_v60 }
 0x802   : > { %v932_v62 = vpop.f32.mrf.mxu2 }
 0x803   : > { %v936_v63 = vadd.f32 %v932_v62, %v1783_v0 }
 0x805   : > { %v941_v1 = vadd.f32 %v1358_v61, %v936_v63 }
 0x807   : > { %942 = vst [vmem:[%s330_s15] sm:$0xff] %v941_v1 }
 0x808   : > { %1543 = shalt.err (!%p1540_p9)
}
 0x809   : > { %1281 = dma.vmem_to_hbm [thread:$0]  (%p1730_p4), %s957_s27, 128, %s959_s30, %s944_s28  }
 0x80a   : > { %v934_v0 = vpop.f32.mrf.mxu2 }
 0x80b PF: > { %s970_s16 = sand.u32 1, %s1582_s21   ;;  %p1892_p10 = scmp.ge.s32.totalorder %s1594_s24, 2 }
 0x80c   : > { %s971_s13 = scalar_lea.sflag [#allocation5], %s970_s16 }
 0x80d   : > { %p1301_p13 = pnand %p1892_p10, %p1734_p6 }
 0x80f   : > { %p1302_p11 = pneg %p1301_p13 }
 0x811   : > { %1577 = dma.done.wait (%p1302_p11), %s971_s13, 128  }
 0x812   : > { %1579 = vsyncadd (%p1302_p11), %s971_s13, 4294967168  ;;  %p22_p0 = scmp.ge.s32.totalorder %s1704_s10, 4   ;;  %s1893_s21 = smov %s1586_s22 }
 0x813   : > { %s1894_s22 = smov %s1590_s23  ;;  %s1895_s23 = smov %s1715_s14 }
 0x814   : > { %s1896_s24 = smov %s1704_s10  ;;  %24 = sbr.rel (!%p22_p0) target bundleno = 10 (0xa), region = 106 }
 0x819   :  { %977 = vsyncpa [#allocation4], 1 }
 0x81a   :  { %979 = vsyncpa [#allocation4 + $0x1], 1 }
 0x81b   :  { %980 = vsyncpa [#allocation9], 1 }
 0x81c   :  { %981 = vsyncpa [#allocation12], 1 }
 0x81d   :  { %982 = vsyncpa [#allocation5], 1 }
 0x81e   :  { %984 = vsyncpa [#allocation5 + $0x1], 1 }
 0x81f   :  { %985 = vsyncpa [#allocation6], 1 }
 0x820   :  { %987 = vsyncpa [#allocation6 + $0x1], 1 }

</bundles_post_ra>
